<compile_context>
chip_gen: v7x
topology: tpu7x:2x2x1
jax: 0.10.0
libtpu: 0.0.40
codegen_flags: <defaults>
</compile_context>

<pallas_src>
import functools

import jax
import jax.numpy as jnp
from jax.experimental import pallas as pl
from jax.experimental.pallas import tpu as pltpu


# ----------------------------- Pallas kernel ------------------------------- #

def _fused_lstm_kernel(n_layers, T, B, H, *refs):
    """Fused forward: n_layers stacked LSTMs + linear head, single invocation.

    refs layout (all VMEM):
      x_ref                          : (T*B, D0)       time-major flattened input
      [w_ih_l, w_hh_l, bias_l] * L   : (Dl, 4H), (H, 4H), (1, 4H)
                                       gate column order [i, f, o, g]
      w_out_ref, b_out_ref           : (H, C), (1, C)
      out_ref                        : (B, C)
      hs_ref (scratch, if L > 1)     : (T*B, H)        inter-layer hidden states
    """
    x_ref = refs[0]
    layer_refs = refs[1:1 + 3 * n_layers]
    w_out_ref = refs[1 + 3 * n_layers]
    b_out_ref = refs[2 + 3 * n_layers]
    out_ref = refs[3 + 3 * n_layers]
    hs_ref = refs[4 + 3 * n_layers] if n_layers > 1 else None

    h = None
    for l in range(n_layers):
        w_ih = layer_refs[3 * l][...]       # (D_in, 4H)
        w_hh = layer_refs[3 * l + 1][...]   # (H, 4H)
        bias = layer_refs[3 * l + 2][...]   # (1, 4H)

        # Time-major activations for this layer: (T*B, D_in).
        x_tm = x_ref[...] if l == 0 else hs_ref[...]

        # Hoisted input projection: ONE MXU matmul for all timesteps.
        gx = jnp.dot(x_tm, w_ih, preferred_element_type=jnp.float32) + bias  # (T*B, 4H)

        h = jnp.zeros((B, H), jnp.float32)
        c = jnp.zeros((B, H), jnp.float32)
        # T is a compile-time constant -> fully unrolled serial recurrence.
        for t in range(T):
            # Leading-axis (sublane-range) slice of the time-major projection.
            gates = gx[t * B:(t + 1) * B, :] + jnp.dot(
                h, w_hh, preferred_element_type=jnp.float32)      # (B, 4H)
            # Gate columns are [i | f | o | g]: one sigmoid over the whole tile,
            # one tanh over the g lanes -> 2 EUP chains per step instead of 4.
            sig = jax.nn.sigmoid(gates)
            i_g = sig[:, 0 * H:1 * H]
            f_g = sig[:, 1 * H:2 * H]
            o_g = sig[:, 2 * H:3 * H]
            g_g = jnp.tanh(gates[:, 3 * H:4 * H])
            c = f_g * c + i_g * g_g
            h = o_g * jnp.tanh(c)
            if l < n_layers - 1:
                hs_ref[pl.ds(t * B, B), :] = h     # time-major scratch store

    # Fused linear head on the last timestep's hidden state of the last layer.
    out_ref[...] = (jnp.dot(h, w_out_ref[...],
                            preferred_element_type=jnp.float32)
                    + b_out_ref[...])


# ------------------------------ wrapper ------------------------------------ #

def _full_spec(shape):
    zeros = (0,) * len(shape)
    return pl.BlockSpec(shape, lambda zeros=zeros: zeros)


def prepare_params(params):
    """One-time conversion from PyTorch layout to kernel layout.

    - gate row blocks reordered [i, f, g, o] -> [i, f, o, g]
    - weights transposed to (in_dim, 4H) / (H, 4H) / (H, C)
    - b_ih + b_hh combined into one (1, 4H) bias
    """
    H = params["lstm"][0][1].shape[1]
    perm = jnp.concatenate([jnp.arange(0, H), jnp.arange(H, 2 * H),
                            jnp.arange(3 * H, 4 * H), jnp.arange(2 * H, 3 * H)])
    layers = []
    for (w_ih, w_hh, b_ih, b_hh) in params["lstm"]:
        layers.append((
            jnp.transpose(w_ih[perm, :]),          # (D_in, 4H), cols [i,f,o,g]
            jnp.transpose(w_hh[perm, :]),          # (H, 4H),    cols [i,f,o,g]
            (b_ih + b_hh)[perm][None, :],          # (1, 4H)
        ))
    return {
        "lstm": layers,
        "w_out": jnp.transpose(params["w_out"]),   # (H, C)
        "b_out": params["b_out"][None, :],         # (1, C)
        "hidden": H,
    }


def lstm_model_forward(X, kparams):
    """Equivalent of the PyTorch LSTM module's forward.  X: (B, T, input_len)."""
    B, T, D0 = X.shape
    H = kparams["hidden"]
    n_layers = len(kparams["lstm"])
    C = kparams["w_out"].shape[1]

    # Time-major flatten of the input (tiny one-off relayout; lets every
    # per-timestep gx access in the kernel be a leading-axis slice).
    x_tm = jnp.transpose(X, (1, 0, 2)).reshape(T * B, D0)

    args = [x_tm]
    specs = [_full_spec(x_tm.shape)]
    for (w_ih, w_hh, bias) in kparams["lstm"]:
        args += [w_ih, w_hh, bias]
        specs += [_full_spec(w_ih.shape),
                  _full_spec(w_hh.shape),
                  _full_spec(bias.shape)]
    args += [kparams["w_out"], kparams["b_out"]]
    specs += [_full_spec(kparams["w_out"].shape),
              _full_spec(kparams["b_out"].shape)]

    scratch = ([pltpu.VMEM((T * B, H), jnp.float32)] if n_layers > 1 else [])

    kernel = functools.partial(_fused_lstm_kernel, n_layers, T, B, H)
    return pl.pallas_call(
        kernel,
        out_shape=jax.ShapeDtypeStruct((B, C), jnp.float32),
        in_specs=specs,
        out_specs=_full_spec((B, C)),
        scratch_shapes=scratch,
        compiler_params=pltpu.CompilerParams(
            vmem_limit_bytes=32 * 1024 * 1024),
    )(*args)


# --------------------------- reference (pure JAX) --------------------------- #

def lstm_model_ref(X, params):
    x = X
    for (w_ih, w_hh, b_ih, b_hh) in params["lstm"]:
        H = w_hh.shape[1]

        def step(carry, xt):
            h, c = carry
            gates = xt @ w_ih.T + h @ w_hh.T + b_ih + b_hh
            i, f, g, o = jnp.split(gates, 4, axis=-1)
            i = jax.nn.sigmoid(i)
            f = jax.nn.sigmoid(f)
            g = jnp.tanh(g)
            o = jax.nn.sigmoid(o)
            c = f * c + i * g
            h = o * jnp.tanh(c)
            return (h, c), h

        h0 = jnp.zeros((x.shape[0], H), jnp.float32)
        c0 = jnp.zeros_like(h0)
        _, hs = jax.lax.scan(step, (h0, c0), jnp.transpose(x, (1, 0, 2)))
        x = jnp.transpose(hs, (1, 0, 2))
    return x[:, -1, :] @ params["w_out"].T + params["b_out"]


# --------------------------------- main ------------------------------------ #

def init_params(key, input_len, hidden_size, num_classes, n_layers):
    """Deterministic init mimicking PyTorch's U(-1/sqrt(H), 1/sqrt(H))."""
    k = 1.0 / jnp.sqrt(hidden_size)
    params = {"lstm": []}
    for layer in range(n_layers):
        d_in = input_len if layer == 0 else hidden_size
        key, k1, k2, k3, k4 = jax.random.split(key, 5)
        w_ih = jax.random.uniform(k1, (4 * hidden_size, d_in), jnp.float32, -k, k)
        w_hh = jax.random.uniform(k2, (4 * hidden_size, hidden_size), jnp.float32, -k, k)
        b_ih = jax.random.uniform(k3, (4 * hidden_size,), jnp.float32, -k, k)
        b_hh = jax.random.uniform(k4, (4 * hidden_size,), jnp.float32, -k, k)
        params["lstm"].append((w_ih, w_hh, b_ih, b_hh))
    key, k5, k6 = jax.random.split(key, 3)
    params["w_out"] = jax.random.uniform(k5, (num_classes, hidden_size), jnp.float32, -k, k)
    params["b_out"] = jax.random.uniform(k6, (num_classes,), jnp.float32, -k, k)
    return params


if __name__ == "__main__":
    input_len, hidden_size, num_classes, n_layers = 16, 32, 4, 2
    B, T = 2, 8

    key = jax.random.PRNGKey(0)
    key, xkey = jax.random.split(key)
    X = jax.random.normal(xkey, (B, T, input_len), jnp.float32)
    params = init_params(key, input_len, hidden_size, num_classes, n_layers)

    # One-time parameter preparation (transposes, gate reorder, bias fuse).
    kparams = prepare_params(params)

    out = lstm_model_forward(X, kparams)
    out = jax.block_until_ready(out)

    ref = lstm_model_ref(X, params)
    assert out.shape == (B, num_classes)
    assert jnp.allclose(out, ref, atol=1e-5, rtol=1e-5), (out, ref)

    print("KERNEL_OK")
</pallas_src>

<mosaic_0001>
module attributes {stable_mosaic.version = 11 : i64} {
  func.func @_fused_lstm_kernel(%arg0: memref<16x16xf32, #tpu.memory_space<vmem>>, %arg1: memref<16x128xf32, #tpu.memory_space<vmem>>, %arg2: memref<32x128xf32, #tpu.memory_space<vmem>>, %arg3: memref<1x128xf32, #tpu.memory_space<vmem>>, %arg4: memref<32x128xf32, #tpu.memory_space<vmem>>, %arg5: memref<32x128xf32, #tpu.memory_space<vmem>>, %arg6: memref<1x128xf32, #tpu.memory_space<vmem>>, %arg7: memref<32x4xf32, #tpu.memory_space<vmem>>, %arg8: memref<1x4xf32, #tpu.memory_space<vmem>>, %arg9: memref<2x4xf32, #tpu.memory_space<vmem>>, %arg10: memref<16x32xf32, #tpu.memory_space<vmem>>) attributes {dimension_semantics = [], scalar_prefetch = 0 : i64, scratch_operands = 1 : i64, tpu.core_type = #tpu.core_type<tc>} {
    %c0 = arith.constant 0 : index
    %c0_0 = arith.constant 0 : index
    %0 = vector.load %arg1[%c0, %c0_0] : memref<16x128xf32, #tpu.memory_space<vmem>>, vector<16x128xf32>
    %c0_1 = arith.constant 0 : index
    %c0_2 = arith.constant 0 : index
    %1 = vector.load %arg2[%c0_1, %c0_2] : memref<32x128xf32, #tpu.memory_space<vmem>>, vector<32x128xf32>
    %c0_3 = arith.constant 0 : index
    %c0_4 = arith.constant 0 : index
    %2 = vector.load %arg3[%c0_3, %c0_4] : memref<1x128xf32, #tpu.memory_space<vmem>>, vector<1x128xf32>
    %c0_5 = arith.constant 0 : index
    %c0_6 = arith.constant 0 : index
    %3 = vector.load %arg0[%c0_5, %c0_6] : memref<16x16xf32, #tpu.memory_space<vmem>>, vector<16x16xf32>
    %cst = arith.constant dense<0.000000e+00> : vector<16x128xf32>
    %4 = tpu.matmul %3, %0, %cst {dimension_numbers = #tpu.dot_dimension_numbers<[1], [0], [0], [1], [0, 0, 1, 1], [], []>} : vector<16x16xf32>, vector<16x128xf32>, vector<16x128xf32> -> vector<16x128xf32>
    %5 = vector.broadcast %2 : vector<1x128xf32> to vector<16x128xf32>
    %6 = arith.addf %4, %5 : vector<16x128xf32>
    %cst_7 = arith.constant 0.000000e+00 : f32
    %7 = vector.broadcast %cst_7 : f32 to vector<2x32xf32>
    %cst_8 = arith.constant 0.000000e+00 : f32
    %8 = vector.broadcast %cst_8 : f32 to vector<2x32xf32>
    %9 = vector.extract_strided_slice %6 {offsets = [0, 0], sizes = [2, 128], strides = [1, 1]} : vector<16x128xf32> to vector<2x128xf32>
    %cst_9 = arith.constant dense<0.000000e+00> : vector<2x128xf32>
    %10 = tpu.matmul %7, %1, %cst_9 {dimension_numbers = #tpu.dot_dimension_numbers<[1], [0], [0], [1], [0, 0, 1, 1], [], []>} : vector<2x32xf32>, vector<32x128xf32>, vector<2x128xf32> -> vector<2x128xf32>
    %11 = arith.addf %9, %10 : vector<2x128xf32>
    %12 = arith.negf %11 : vector<2x128xf32>
    %13 = math.exp %12 : vector<2x128xf32>
    %cst_10 = arith.constant 1.000000e+00 : f32
    %14 = vector.broadcast %cst_10 : f32 to vector<2x128xf32>
    %15 = arith.addf %14, %13 : vector<2x128xf32>
    %16 = arith.divf %14, %15 : vector<2x128xf32>
    %17 = vector.extract_strided_slice %16 {offsets = [0, 0], sizes = [2, 32], strides = [1, 1]} : vector<2x128xf32> to vector<2x32xf32>
    %18 = vector.extract_strided_slice %16 {offsets = [0, 32], sizes = [2, 32], strides = [1, 1]} : vector<2x128xf32> to vector<2x32xf32>
    %19 = vector.extract_strided_slice %16 {offsets = [0, 64], sizes = [2, 32], strides = [1, 1]} : vector<2x128xf32> to vector<2x32xf32>
    %20 = vector.extract_strided_slice %11 {offsets = [0, 96], sizes = [2, 32], strides = [1, 1]} : vector<2x128xf32> to vector<2x32xf32>
    %21 = math.tanh %20 : vector<2x32xf32>
    %22 = arith.mulf %18, %8 : vector<2x32xf32>
    %23 = arith.mulf %17, %21 : vector<2x32xf32>
    %24 = arith.addf %22, %23 : vector<2x32xf32>
    %25 = math.tanh %24 : vector<2x32xf32>
    %26 = arith.mulf %19, %25 : vector<2x32xf32>
    %c0_11 = arith.constant 0 : index
    %c0_12 = arith.constant 0 : index
    %27 = vector.load %arg10[%c0_11, %c0_12] : memref<16x32xf32, #tpu.memory_space<vmem>>, vector<2x32xf32>
    tpu.vector_store %arg10[%c0_11, %c0_12], %26 {strides = array<i32>} : memref<16x32xf32, #tpu.memory_space<vmem>>, vector<2x32xf32>,
    %28 = vector.extract_strided_slice %6 {offsets = [2, 0], sizes = [2, 128], strides = [1, 1]} : vector<16x128xf32> to vector<2x128xf32>
    %cst_13 = arith.constant dense<0.000000e+00> : vector<2x128xf32>
    %29 = tpu.matmul %26, %1, %cst_13 {dimension_numbers = #tpu.dot_dimension_numbers<[1], [0], [0], [1], [0, 0, 1, 1], [], []>} : vector<2x32xf32>, vector<32x128xf32>, vector<2x128xf32> -> vector<2x128xf32>
    %30 = arith.addf %28, %29 : vector<2x128xf32>
    %31 = arith.negf %30 : vector<2x128xf32>
    %32 = math.exp %31 : vector<2x128xf32>
    %cst_14 = arith.constant 1.000000e+00 : f32
    %33 = vector.broadcast %cst_14 : f32 to vector<2x128xf32>
    %34 = arith.addf %33, %32 : vector<2x128xf32>
    %35 = arith.divf %33, %34 : vector<2x128xf32>
    %36 = vector.extract_strided_slice %35 {offsets = [0, 0], sizes = [2, 32], strides = [1, 1]} : vector<2x128xf32> to vector<2x32xf32>
    %37 = vector.extract_strided_slice %35 {offsets = [0, 32], sizes = [2, 32], strides = [1, 1]} : vector<2x128xf32> to vector<2x32xf32>
    %38 = vector.extract_strided_slice %35 {offsets = [0, 64], sizes = [2, 32], strides = [1, 1]} : vector<2x128xf32> to vector<2x32xf32>
    %39 = vector.extract_strided_slice %30 {offsets = [0, 96], sizes = [2, 32], strides = [1, 1]} : vector<2x128xf32> to vector<2x32xf32>
    %40 = math.tanh %39 : vector<2x32xf32>
    %41 = arith.mulf %37, %24 : vector<2x32xf32>
    %42 = arith.mulf %36, %40 : vector<2x32xf32>
    %43 = arith.addf %41, %42 : vector<2x32xf32>
    %44 = math.tanh %43 : vector<2x32xf32>
    %45 = arith.mulf %38, %44 : vector<2x32xf32>
    %c2 = arith.constant 2 : index
    %c0_15 = arith.constant 0 : index
    %46 = vector.load %arg10[%c2, %c0_15] : memref<16x32xf32, #tpu.memory_space<vmem>>, vector<2x32xf32>
    tpu.vector_store %arg10[%c2, %c0_15], %45 {strides = array<i32>} : memref<16x32xf32, #tpu.memory_space<vmem>>, vector<2x32xf32>,
    %47 = vector.extract_strided_slice %6 {offsets = [4, 0], sizes = [2, 128], strides = [1, 1]} : vector<16x128xf32> to vector<2x128xf32>
    %cst_16 = arith.constant dense<0.000000e+00> : vector<2x128xf32>
    %48 = tpu.matmul %45, %1, %cst_16 {dimension_numbers = #tpu.dot_dimension_numbers<[1], [0], [0], [1], [0, 0, 1, 1], [], []>} : vector<2x32xf32>, vector<32x128xf32>, vector<2x128xf32> -> vector<2x128xf32>
    %49 = arith.addf %47, %48 : vector<2x128xf32>
    %50 = arith.negf %49 : vector<2x128xf32>
    %51 = math.exp %50 : vector<2x128xf32>
    %cst_17 = arith.constant 1.000000e+00 : f32
    %52 = vector.broadcast %cst_17 : f32 to vector<2x128xf32>
    %53 = arith.addf %52, %51 : vector<2x128xf32>
    %54 = arith.divf %52, %53 : vector<2x128xf32>
    %55 = vector.extract_strided_slice %54 {offsets = [0, 0], sizes = [2, 32], strides = [1, 1]} : vector<2x128xf32> to vector<2x32xf32>
    %56 = vector.extract_strided_slice %54 {offsets = [0, 32], sizes = [2, 32], strides = [1, 1]} : vector<2x128xf32> to vector<2x32xf32>
    %57 = vector.extract_strided_slice %54 {offsets = [0, 64], sizes = [2, 32], strides = [1, 1]} : vector<2x128xf32> to vector<2x32xf32>
    %58 = vector.extract_strided_slice %49 {offsets = [0, 96], sizes = [2, 32], strides = [1, 1]} : vector<2x128xf32> to vector<2x32xf32>
    %59 = math.tanh %58 : vector<2x32xf32>
    %60 = arith.mulf %56, %43 : vector<2x32xf32>
    %61 = arith.mulf %55, %59 : vector<2x32xf32>
    %62 = arith.addf %60, %61 : vector<2x32xf32>
    %63 = math.tanh %62 : vector<2x32xf32>
    %64 = arith.mulf %57, %63 : vector<2x32xf32>
    %c4 = arith.constant 4 : index
    %c0_18 = arith.constant 0 : index
    %65 = vector.load %arg10[%c4, %c0_18] : memref<16x32xf32, #tpu.memory_space<vmem>>, vector<2x32xf32>
    tpu.vector_store %arg10[%c4, %c0_18], %64 {strides = array<i32>} : memref<16x32xf32, #tpu.memory_space<vmem>>, vector<2x32xf32>,
    %66 = vector.extract_strided_slice %6 {offsets = [6, 0], sizes = [2, 128], strides = [1, 1]} : vector<16x128xf32> to vector<2x128xf32>
    %cst_19 = arith.constant dense<0.000000e+00> : vector<2x128xf32>
    %67 = tpu.matmul %64, %1, %cst_19 {dimension_numbers = #tpu.dot_dimension_numbers<[1], [0], [0], [1], [0, 0, 1, 1], [], []>} : vector<2x32xf32>, vector<32x128xf32>, vector<2x128xf32> -> vector<2x128xf32>
    %68 = arith.addf %66, %67 : vector<2x128xf32>
    %69 = arith.negf %68 : vector<2x128xf32>
    %70 = math.exp %69 : vector<2x128xf32>
    %cst_20 = arith.constant 1.000000e+00 : f32
    %71 = vector.broadcast %cst_20 : f32 to vector<2x128xf32>
    %72 = arith.addf %71, %70 : vector<2x128xf32>
    %73 = arith.divf %71, %72 : vector<2x128xf32>
    %74 = vector.extract_strided_slice %73 {offsets = [0, 0], sizes = [2, 32], strides = [1, 1]} : vector<2x128xf32> to vector<2x32xf32>
    %75 = vector.extract_strided_slice %73 {offsets = [0, 32], sizes = [2, 32], strides = [1, 1]} : vector<2x128xf32> to vector<2x32xf32>
    %76 = vector.extract_strided_slice %73 {offsets = [0, 64], sizes = [2, 32], strides = [1, 1]} : vector<2x128xf32> to vector<2x32xf32>
    %77 = vector.extract_strided_slice %68 {offsets = [0, 96], sizes = [2, 32], strides = [1, 1]} : vector<2x128xf32> to vector<2x32xf32>
    %78 = math.tanh %77 : vector<2x32xf32>
    %79 = arith.mulf %75, %62 : vector<2x32xf32>
    %80 = arith.mulf %74, %78 : vector<2x32xf32>
    %81 = arith.addf %79, %80 : vector<2x32xf32>
    %82 = math.tanh %81 : vector<2x32xf32>
    %83 = arith.mulf %76, %82 : vector<2x32xf32>
    %c6 = arith.constant 6 : index
    %c0_21 = arith.constant 0 : index
    %84 = vector.load %arg10[%c6, %c0_21] : memref<16x32xf32, #tpu.memory_space<vmem>>, vector<2x32xf32>
    tpu.vector_store %arg10[%c6, %c0_21], %83 {strides = array<i32>} : memref<16x32xf32, #tpu.memory_space<vmem>>, vector<2x32xf32>,
    %85 = vector.extract_strided_slice %6 {offsets = [8, 0], sizes = [2, 128], strides = [1, 1]} : vector<16x128xf32> to vector<2x128xf32>
    %cst_22 = arith.constant dense<0.000000e+00> : vector<2x128xf32>
    %86 = tpu.matmul %83, %1, %cst_22 {dimension_numbers = #tpu.dot_dimension_numbers<[1], [0], [0], [1], [0, 0, 1, 1], [], []>} : vector<2x32xf32>, vector<32x128xf32>, vector<2x128xf32> -> vector<2x128xf32>
    %87 = arith.addf %85, %86 : vector<2x128xf32>
    %88 = arith.negf %87 : vector<2x128xf32>
    %89 = math.exp %88 : vector<2x128xf32>
    %cst_23 = arith.constant 1.000000e+00 : f32
    %90 = vector.broadcast %cst_23 : f32 to vector<2x128xf32>
    %91 = arith.addf %90, %89 : vector<2x128xf32>
    %92 = arith.divf %90, %91 : vector<2x128xf32>
    %93 = vector.extract_strided_slice %92 {offsets = [0, 0], sizes = [2, 32], strides = [1, 1]} : vector<2x128xf32> to vector<2x32xf32>
    %94 = vector.extract_strided_slice %92 {offsets = [0, 32], sizes = [2, 32], strides = [1, 1]} : vector<2x128xf32> to vector<2x32xf32>
    %95 = vector.extract_strided_slice %92 {offsets = [0, 64], sizes = [2, 32], strides = [1, 1]} : vector<2x128xf32> to vector<2x32xf32>
    %96 = vector.extract_strided_slice %87 {offsets = [0, 96], sizes = [2, 32], strides = [1, 1]} : vector<2x128xf32> to vector<2x32xf32>
    %97 = math.tanh %96 : vector<2x32xf32>
    %98 = arith.mulf %94, %81 : vector<2x32xf32>
    %99 = arith.mulf %93, %97 : vector<2x32xf32>
    %100 = arith.addf %98, %99 : vector<2x32xf32>
    %101 = math.tanh %100 : vector<2x32xf32>
    %102 = arith.mulf %95, %101 : vector<2x32xf32>
    %c8 = arith.constant 8 : index
    %c0_24 = arith.constant 0 : index
    %103 = vector.load %arg10[%c8, %c0_24] : memref<16x32xf32, #tpu.memory_space<vmem>>, vector<2x32xf32>
    tpu.vector_store %arg10[%c8, %c0_24], %102 {strides = array<i32>} : memref<16x32xf32, #tpu.memory_space<vmem>>, vector<2x32xf32>,
    %104 = vector.extract_strided_slice %6 {offsets = [10, 0], sizes = [2, 128], strides = [1, 1]} : vector<16x128xf32> to vector<2x128xf32>
    %cst_25 = arith.constant dense<0.000000e+00> : vector<2x128xf32>
    %105 = tpu.matmul %102, %1, %cst_25 {dimension_numbers = #tpu.dot_dimension_numbers<[1], [0], [0], [1], [0, 0, 1, 1], [], []>} : vector<2x32xf32>, vector<32x128xf32>, vector<2x128xf32> -> vector<2x128xf32>
    %106 = arith.addf %104, %105 : vector<2x128xf32>
    %107 = arith.negf %106 : vector<2x128xf32>
    %108 = math.exp %107 : vector<2x128xf32>
    %cst_26 = arith.constant 1.000000e+00 : f32
    %109 = vector.broadcast %cst_26 : f32 to vector<2x128xf32>
    %110 = arith.addf %109, %108 : vector<2x128xf32>
    %111 = arith.divf %109, %110 : vector<2x128xf32>
    %112 = vector.extract_strided_slice %111 {offsets = [0, 0], sizes = [2, 32], strides = [1, 1]} : vector<2x128xf32> to vector<2x32xf32>
    %113 = vector.extract_strided_slice %111 {offsets = [0, 32], sizes = [2, 32], strides = [1, 1]} : vector<2x128xf32> to vector<2x32xf32>
    %114 = vector.extract_strided_slice %111 {offsets = [0, 64], sizes = [2, 32], strides = [1, 1]} : vector<2x128xf32> to vector<2x32xf32>
    %115 = vector.extract_strided_slice %106 {offsets = [0, 96], sizes = [2, 32], strides = [1, 1]} : vector<2x128xf32> to vector<2x32xf32>
    %116 = math.tanh %115 : vector<2x32xf32>
    %117 = arith.mulf %113, %100 : vector<2x32xf32>
    %118 = arith.mulf %112, %116 : vector<2x32xf32>
    %119 = arith.addf %117, %118 : vector<2x32xf32>
    %120 = math.tanh %119 : vector<2x32xf32>
    %121 = arith.mulf %114, %120 : vector<2x32xf32>
    %c10 = arith.constant 10 : index
    %c0_27 = arith.constant 0 : index
    %122 = vector.load %arg10[%c10, %c0_27] : memref<16x32xf32, #tpu.memory_space<vmem>>, vector<2x32xf32>
    tpu.vector_store %arg10[%c10, %c0_27], %121 {strides = array<i32>} : memref<16x32xf32, #tpu.memory_space<vmem>>, vector<2x32xf32>,
    %123 = vector.extract_strided_slice %6 {offsets = [12, 0], sizes = [2, 128], strides = [1, 1]} : vector<16x128xf32> to vector<2x128xf32>
    %cst_28 = arith.constant dense<0.000000e+00> : vector<2x128xf32>
    %124 = tpu.matmul %121, %1, %cst_28 {dimension_numbers = #tpu.dot_dimension_numbers<[1], [0], [0], [1], [0, 0, 1, 1], [], []>} : vector<2x32xf32>, vector<32x128xf32>, vector<2x128xf32> -> vector<2x128xf32>
    %125 = arith.addf %123, %124 : vector<2x128xf32>
    %126 = arith.negf %125 : vector<2x128xf32>
    %127 = math.exp %126 : vector<2x128xf32>
    %cst_29 = arith.constant 1.000000e+00 : f32
    %128 = vector.broadcast %cst_29 : f32 to vector<2x128xf32>
    %129 = arith.addf %128, %127 : vector<2x128xf32>
    %130 = arith.divf %128, %129 : vector<2x128xf32>
    %131 = vector.extract_strided_slice %130 {offsets = [0, 0], sizes = [2, 32], strides = [1, 1]} : vector<2x128xf32> to vector<2x32xf32>
    %132 = vector.extract_strided_slice %130 {offsets = [0, 32], sizes = [2, 32], strides = [1, 1]} : vector<2x128xf32> to vector<2x32xf32>
    %133 = vector.extract_strided_slice %130 {offsets = [0, 64], sizes = [2, 32], strides = [1, 1]} : vector<2x128xf32> to vector<2x32xf32>
    %134 = vector.extract_strided_slice %125 {offsets = [0, 96], sizes = [2, 32], strides = [1, 1]} : vector<2x128xf32> to vector<2x32xf32>
    %135 = math.tanh %134 : vector<2x32xf32>
    %136 = arith.mulf %132, %119 : vector<2x32xf32>
    %137 = arith.mulf %131, %135 : vector<2x32xf32>
    %138 = arith.addf %136, %137 : vector<2x32xf32>
    %139 = math.tanh %138 : vector<2x32xf32>
    %140 = arith.mulf %133, %139 : vector<2x32xf32>
    %c12 = arith.constant 12 : index
    %c0_30 = arith.constant 0 : index
    %141 = vector.load %arg10[%c12, %c0_30] : memref<16x32xf32, #tpu.memory_space<vmem>>, vector<2x32xf32>
    tpu.vector_store %arg10[%c12, %c0_30], %140 {strides = array<i32>} : memref<16x32xf32, #tpu.memory_space<vmem>>, vector<2x32xf32>,
    %142 = vector.extract_strided_slice %6 {offsets = [14, 0], sizes = [2, 128], strides = [1, 1]} : vector<16x128xf32> to vector<2x128xf32>
    %cst_31 = arith.constant dense<0.000000e+00> : vector<2x128xf32>
    %143 = tpu.matmul %140, %1, %cst_31 {dimension_numbers = #tpu.dot_dimension_numbers<[1], [0], [0], [1], [0, 0, 1, 1], [], []>} : vector<2x32xf32>, vector<32x128xf32>, vector<2x128xf32> -> vector<2x128xf32>
    %144 = arith.addf %142, %143 : vector<2x128xf32>
    %145 = arith.negf %144 : vector<2x128xf32>
    %146 = math.exp %145 : vector<2x128xf32>
    %cst_32 = arith.constant 1.000000e+00 : f32
    %147 = vector.broadcast %cst_32 : f32 to vector<2x128xf32>
    %148 = arith.addf %147, %146 : vector<2x128xf32>
    %149 = arith.divf %147, %148 : vector<2x128xf32>
    %150 = vector.extract_strided_slice %149 {offsets = [0, 0], sizes = [2, 32], strides = [1, 1]} : vector<2x128xf32> to vector<2x32xf32>
    %151 = vector.extract_strided_slice %149 {offsets = [0, 32], sizes = [2, 32], strides = [1, 1]} : vector<2x128xf32> to vector<2x32xf32>
    %152 = vector.extract_strided_slice %149 {offsets = [0, 64], sizes = [2, 32], strides = [1, 1]} : vector<2x128xf32> to vector<2x32xf32>
    %153 = vector.extract_strided_slice %144 {offsets = [0, 96], sizes = [2, 32], strides = [1, 1]} : vector<2x128xf32> to vector<2x32xf32>
    %154 = math.tanh %153 : vector<2x32xf32>
    %155 = arith.mulf %151, %138 : vector<2x32xf32>
    %156 = arith.mulf %150, %154 : vector<2x32xf32>
    %157 = arith.addf %155, %156 : vector<2x32xf32>
    %158 = math.tanh %157 : vector<2x32xf32>
    %159 = arith.mulf %152, %158 : vector<2x32xf32>
    %c14 = arith.constant 14 : index
    %c0_33 = arith.constant 0 : index
    %160 = vector.load %arg10[%c14, %c0_33] : memref<16x32xf32, #tpu.memory_space<vmem>>, vector<2x32xf32>
    tpu.vector_store %arg10[%c14, %c0_33], %159 {strides = array<i32>} : memref<16x32xf32, #tpu.memory_space<vmem>>, vector<2x32xf32>,
    %c0_34 = arith.constant 0 : index
    %c0_35 = arith.constant 0 : index
    %161 = vector.load %arg4[%c0_34, %c0_35] : memref<32x128xf32, #tpu.memory_space<vmem>>, vector<32x128xf32>
    %c0_36 = arith.constant 0 : index
    %c0_37 = arith.constant 0 : index
    %162 = vector.load %arg5[%c0_36, %c0_37] : memref<32x128xf32, #tpu.memory_space<vmem>>, vector<32x128xf32>
    %c0_38 = arith.constant 0 : index
    %c0_39 = arith.constant 0 : index
    %163 = vector.load %arg6[%c0_38, %c0_39] : memref<1x128xf32, #tpu.memory_space<vmem>>, vector<1x128xf32>
    %c0_40 = arith.constant 0 : index
    %c0_41 = arith.constant 0 : index
    %164 = vector.load %arg10[%c0_40, %c0_41] : memref<16x32xf32, #tpu.memory_space<vmem>>, vector<16x32xf32>
    %cst_42 = arith.constant dense<0.000000e+00> : vector<16x128xf32>
    %165 = tpu.matmul %164, %161, %cst_42 {dimension_numbers = #tpu.dot_dimension_numbers<[1], [0], [0], [1], [0, 0, 1, 1], [], []>} : vector<16x32xf32>, vector<32x128xf32>, vector<16x128xf32> -> vector<16x128xf32>
    %166 = vector.broadcast %163 : vector<1x128xf32> to vector<16x128xf32>
    %167 = arith.addf %165, %166 : vector<16x128xf32>
    %cst_43 = arith.constant 0.000000e+00 : f32
    %168 = vector.broadcast %cst_43 : f32 to vector<2x32xf32>
    %cst_44 = arith.constant 0.000000e+00 : f32
    %169 = vector.broadcast %cst_44 : f32 to vector<2x32xf32>
    %170 = vector.extract_strided_slice %167 {offsets = [0, 0], sizes = [2, 128], strides = [1, 1]} : vector<16x128xf32> to vector<2x128xf32>
    %cst_45 = arith.constant dense<0.000000e+00> : vector<2x128xf32>
    %171 = tpu.matmul %168, %162, %cst_45 {dimension_numbers = #tpu.dot_dimension_numbers<[1], [0], [0], [1], [0, 0, 1, 1], [], []>} : vector<2x32xf32>, vector<32x128xf32>, vector<2x128xf32> -> vector<2x128xf32>
    %172 = arith.addf %170, %171 : vector<2x128xf32>
    %173 = arith.negf %172 : vector<2x128xf32>
    %174 = math.exp %173 : vector<2x128xf32>
    %cst_46 = arith.constant 1.000000e+00 : f32
    %175 = vector.broadcast %cst_46 : f32 to vector<2x128xf32>
    %176 = arith.addf %175, %174 : vector<2x128xf32>
    %177 = arith.divf %175, %176 : vector<2x128xf32>
    %178 = vector.extract_strided_slice %177 {offsets = [0, 0], sizes = [2, 32], strides = [1, 1]} : vector<2x128xf32> to vector<2x32xf32>
    %179 = vector.extract_strided_slice %177 {offsets = [0, 32], sizes = [2, 32], strides = [1, 1]} : vector<2x128xf32> to vector<2x32xf32>
    %180 = vector.extract_strided_slice %177 {offsets = [0, 64], sizes = [2, 32], strides = [1, 1]} : vector<2x128xf32> to vector<2x32xf32>
    %181 = vector.extract_strided_slice %172 {offsets = [0, 96], sizes = [2, 32], strides = [1, 1]} : vector<2x128xf32> to vector<2x32xf32>
    %182 = math.tanh %181 : vector<2x32xf32>
    %183 = arith.mulf %179, %169 : vector<2x32xf32>
    %184 = arith.mulf %178, %182 : vector<2x32xf32>
    %185 = arith.addf %183, %184 : vector<2x32xf32>
    %186 = math.tanh %185 : vector<2x32xf32>
    %187 = arith.mulf %180, %186 : vector<2x32xf32>
    %188 = vector.extract_strided_slice %167 {offsets = [2, 0], sizes = [2, 128], strides = [1, 1]} : vector<16x128xf32> to vector<2x128xf32>
    %cst_47 = arith.constant dense<0.000000e+00> : vector<2x128xf32>
    %189 = tpu.matmul %187, %162, %cst_47 {dimension_numbers = #tpu.dot_dimension_numbers<[1], [0], [0], [1], [0, 0, 1, 1], [], []>} : vector<2x32xf32>, vector<32x128xf32>, vector<2x128xf32> -> vector<2x128xf32>
    %190 = arith.addf %188, %189 : vector<2x128xf32>
    %191 = arith.negf %190 : vector<2x128xf32>
    %192 = math.exp %191 : vector<2x128xf32>
    %cst_48 = arith.constant 1.000000e+00 : f32
    %193 = vector.broadcast %cst_48 : f32 to vector<2x128xf32>
    %194 = arith.addf %193, %192 : vector<2x128xf32>
    %195 = arith.divf %193, %194 : vector<2x128xf32>
    %196 = vector.extract_strided_slice %195 {offsets = [0, 0], sizes = [2, 32], strides = [1, 1]} : vector<2x128xf32> to vector<2x32xf32>
    %197 = vector.extract_strided_slice %195 {offsets = [0, 32], sizes = [2, 32], strides = [1, 1]} : vector<2x128xf32> to vector<2x32xf32>
    %198 = vector.extract_strided_slice %195 {offsets = [0, 64], sizes = [2, 32], strides = [1, 1]} : vector<2x128xf32> to vector<2x32xf32>
    %199 = vector.extract_strided_slice %190 {offsets = [0, 96], sizes = [2, 32], strides = [1, 1]} : vector<2x128xf32> to vector<2x32xf32>
    %200 = math.tanh %199 : vector<2x32xf32>
    %201 = arith.mulf %197, %185 : vector<2x32xf32>
    %202 = arith.mulf %196, %200 : vector<2x32xf32>
    %203 = arith.addf %201, %202 : vector<2x32xf32>
    %204 = math.tanh %203 : vector<2x32xf32>
    %205 = arith.mulf %198, %204 : vector<2x32xf32>
    %206 = vector.extract_strided_slice %167 {offsets = [4, 0], sizes = [2, 128], strides = [1, 1]} : vector<16x128xf32> to vector<2x128xf32>
    %cst_49 = arith.constant dense<0.000000e+00> : vector<2x128xf32>
    %207 = tpu.matmul %205, %162, %cst_49 {dimension_numbers = #tpu.dot_dimension_numbers<[1], [0], [0], [1], [0, 0, 1, 1], [], []>} : vector<2x32xf32>, vector<32x128xf32>, vector<2x128xf32> -> vector<2x128xf32>
    %208 = arith.addf %206, %207 : vector<2x128xf32>
    %209 = arith.negf %208 : vector<2x128xf32>
    %210 = math.exp %209 : vector<2x128xf32>
    %cst_50 = arith.constant 1.000000e+00 : f32
    %211 = vector.broadcast %cst_50 : f32 to vector<2x128xf32>
    %212 = arith.addf %211, %210 : vector<2x128xf32>
    %213 = arith.divf %211, %212 : vector<2x128xf32>
    %214 = vector.extract_strided_slice %213 {offsets = [0, 0], sizes = [2, 32], strides = [1, 1]} : vector<2x128xf32> to vector<2x32xf32>
    %215 = vector.extract_strided_slice %213 {offsets = [0, 32], sizes = [2, 32], strides = [1, 1]} : vector<2x128xf32> to vector<2x32xf32>
    %216 = vector.extract_strided_slice %213 {offsets = [0, 64], sizes = [2, 32], strides = [1, 1]} : vector<2x128xf32> to vector<2x32xf32>
    %217 = vector.extract_strided_slice %208 {offsets = [0, 96], sizes = [2, 32], strides = [1, 1]} : vector<2x128xf32> to vector<2x32xf32>
    %218 = math.tanh %217 : vector<2x32xf32>
    %219 = arith.mulf %215, %203 : vector<2x32xf32>
    %220 = arith.mulf %214, %218 : vector<2x32xf32>
    %221 = arith.addf %219, %220 : vector<2x32xf32>
    %222 = math.tanh %221 : vector<2x32xf32>
    %223 = arith.mulf %216, %222 : vector<2x32xf32>
    %224 = vector.extract_strided_slice %167 {offsets = [6, 0], sizes = [2, 128], strides = [1, 1]} : vector<16x128xf32> to vector<2x128xf32>
    %cst_51 = arith.constant dense<0.000000e+00> : vector<2x128xf32>
    %225 = tpu.matmul %223, %162, %cst_51 {dimension_numbers = #tpu.dot_dimension_numbers<[1], [0], [0], [1], [0, 0, 1, 1], [], []>} : vector<2x32xf32>, vector<32x128xf32>, vector<2x128xf32> -> vector<2x128xf32>
    %226 = arith.addf %224, %225 : vector<2x128xf32>
    %227 = arith.negf %226 : vector<2x128xf32>
    %228 = math.exp %227 : vector<2x128xf32>
    %cst_52 = arith.constant 1.000000e+00 : f32
    %229 = vector.broadcast %cst_52 : f32 to vector<2x128xf32>
    %230 = arith.addf %229, %228 : vector<2x128xf32>
    %231 = arith.divf %229, %230 : vector<2x128xf32>
    %232 = vector.extract_strided_slice %231 {offsets = [0, 0], sizes = [2, 32], strides = [1, 1]} : vector<2x128xf32> to vector<2x32xf32>
    %233 = vector.extract_strided_slice %231 {offsets = [0, 32], sizes = [2, 32], strides = [1, 1]} : vector<2x128xf32> to vector<2x32xf32>
    %234 = vector.extract_strided_slice %231 {offsets = [0, 64], sizes = [2, 32], strides = [1, 1]} : vector<2x128xf32> to vector<2x32xf32>
    %235 = vector.extract_strided_slice %226 {offsets = [0, 96], sizes = [2, 32], strides = [1, 1]} : vector<2x128xf32> to vector<2x32xf32>
    %236 = math.tanh %235 : vector<2x32xf32>
    %237 = arith.mulf %233, %221 : vector<2x32xf32>
    %238 = arith.mulf %232, %236 : vector<2x32xf32>
    %239 = arith.addf %237, %238 : vector<2x32xf32>
    %240 = math.tanh %239 : vector<2x32xf32>
    %241 = arith.mulf %234, %240 : vector<2x32xf32>
    %242 = vector.extract_strided_slice %167 {offsets = [8, 0], sizes = [2, 128], strides = [1, 1]} : vector<16x128xf32> to vector<2x128xf32>
    %cst_53 = arith.constant dense<0.000000e+00> : vector<2x128xf32>
    %243 = tpu.matmul %241, %162, %cst_53 {dimension_numbers = #tpu.dot_dimension_numbers<[1], [0], [0], [1], [0, 0, 1, 1], [], []>} : vector<2x32xf32>, vector<32x128xf32>, vector<2x128xf32> -> vector<2x128xf32>
    %244 = arith.addf %242, %243 : vector<2x128xf32>
    %245 = arith.negf %244 : vector<2x128xf32>
    %246 = math.exp %245 : vector<2x128xf32>
    %cst_54 = arith.constant 1.000000e+00 : f32
    %247 = vector.broadcast %cst_54 : f32 to vector<2x128xf32>
    %248 = arith.addf %247, %246 : vector<2x128xf32>
    %249 = arith.divf %247, %248 : vector<2x128xf32>
    %250 = vector.extract_strided_slice %249 {offsets = [0, 0], sizes = [2, 32], strides = [1, 1]} : vector<2x128xf32> to vector<2x32xf32>
    %251 = vector.extract_strided_slice %249 {offsets = [0, 32], sizes = [2, 32], strides = [1, 1]} : vector<2x128xf32> to vector<2x32xf32>
    %252 = vector.extract_strided_slice %249 {offsets = [0, 64], sizes = [2, 32], strides = [1, 1]} : vector<2x128xf32> to vector<2x32xf32>
    %253 = vector.extract_strided_slice %244 {offsets = [0, 96], sizes = [2, 32], strides = [1, 1]} : vector<2x128xf32> to vector<2x32xf32>
    %254 = math.tanh %253 : vector<2x32xf32>
    %255 = arith.mulf %251, %239 : vector<2x32xf32>
    %256 = arith.mulf %250, %254 : vector<2x32xf32>
    %257 = arith.addf %255, %256 : vector<2x32xf32>
    %258 = math.tanh %257 : vector<2x32xf32>
    %259 = arith.mulf %252, %258 : vector<2x32xf32>
    %260 = vector.extract_strided_slice %167 {offsets = [10, 0], sizes = [2, 128], strides = [1, 1]} : vector<16x128xf32> to vector<2x128xf32>
    %cst_55 = arith.constant dense<0.000000e+00> : vector<2x128xf32>
    %261 = tpu.matmul %259, %162, %cst_55 {dimension_numbers = #tpu.dot_dimension_numbers<[1], [0], [0], [1], [0, 0, 1, 1], [], []>} : vector<2x32xf32>, vector<32x128xf32>, vector<2x128xf32> -> vector<2x128xf32>
    %262 = arith.addf %260, %261 : vector<2x128xf32>
    %263 = arith.negf %262 : vector<2x128xf32>
    %264 = math.exp %263 : vector<2x128xf32>
    %cst_56 = arith.constant 1.000000e+00 : f32
    %265 = vector.broadcast %cst_56 : f32 to vector<2x128xf32>
    %266 = arith.addf %265, %264 : vector<2x128xf32>
    %267 = arith.divf %265, %266 : vector<2x128xf32>
    %268 = vector.extract_strided_slice %267 {offsets = [0, 0], sizes = [2, 32], strides = [1, 1]} : vector<2x128xf32> to vector<2x32xf32>
    %269 = vector.extract_strided_slice %267 {offsets = [0, 32], sizes = [2, 32], strides = [1, 1]} : vector<2x128xf32> to vector<2x32xf32>
    %270 = vector.extract_strided_slice %267 {offsets = [0, 64], sizes = [2, 32], strides = [1, 1]} : vector<2x128xf32> to vector<2x32xf32>
    %271 = vector.extract_strided_slice %262 {offsets = [0, 96], sizes = [2, 32], strides = [1, 1]} : vector<2x128xf32> to vector<2x32xf32>
    %272 = math.tanh %271 : vector<2x32xf32>
    %273 = arith.mulf %269, %257 : vector<2x32xf32>
    %274 = arith.mulf %268, %272 : vector<2x32xf32>
    %275 = arith.addf %273, %274 : vector<2x32xf32>
    %276 = math.tanh %275 : vector<2x32xf32>
    %277 = arith.mulf %270, %276 : vector<2x32xf32>
    %278 = vector.extract_strided_slice %167 {offsets = [12, 0], sizes = [2, 128], strides = [1, 1]} : vector<16x128xf32> to vector<2x128xf32>
    %cst_57 = arith.constant dense<0.000000e+00> : vector<2x128xf32>
    %279 = tpu.matmul %277, %162, %cst_57 {dimension_numbers = #tpu.dot_dimension_numbers<[1], [0], [0], [1], [0, 0, 1, 1], [], []>} : vector<2x32xf32>, vector<32x128xf32>, vector<2x128xf32> -> vector<2x128xf32>
    %280 = arith.addf %278, %279 : vector<2x128xf32>
    %281 = arith.negf %280 : vector<2x128xf32>
    %282 = math.exp %281 : vector<2x128xf32>
    %cst_58 = arith.constant 1.000000e+00 : f32
    %283 = vector.broadcast %cst_58 : f32 to vector<2x128xf32>
    %284 = arith.addf %283, %282 : vector<2x128xf32>
    %285 = arith.divf %283, %284 : vector<2x128xf32>
    %286 = vector.extract_strided_slice %285 {offsets = [0, 0], sizes = [2, 32], strides = [1, 1]} : vector<2x128xf32> to vector<2x32xf32>
    %287 = vector.extract_strided_slice %285 {offsets = [0, 32], sizes = [2, 32], strides = [1, 1]} : vector<2x128xf32> to vector<2x32xf32>
    %288 = vector.extract_strided_slice %285 {offsets = [0, 64], sizes = [2, 32], strides = [1, 1]} : vector<2x128xf32> to vector<2x32xf32>
    %289 = vector.extract_strided_slice %280 {offsets = [0, 96], sizes = [2, 32], strides = [1, 1]} : vector<2x128xf32> to vector<2x32xf32>
    %290 = math.tanh %289 : vector<2x32xf32>
    %291 = arith.mulf %287, %275 : vector<2x32xf32>
    %292 = arith.mulf %286, %290 : vector<2x32xf32>
    %293 = arith.addf %291, %292 : vector<2x32xf32>
    %294 = math.tanh %293 : vector<2x32xf32>
    %295 = arith.mulf %288, %294 : vector<2x32xf32>
    %296 = vector.extract_strided_slice %167 {offsets = [14, 0], sizes = [2, 128], strides = [1, 1]} : vector<16x128xf32> to vector<2x128xf32>
    %cst_59 = arith.constant dense<0.000000e+00> : vector<2x128xf32>
    %297 = tpu.matmul %295, %162, %cst_59 {dimension_numbers = #tpu.dot_dimension_numbers<[1], [0], [0], [1], [0, 0, 1, 1], [], []>} : vector<2x32xf32>, vector<32x128xf32>, vector<2x128xf32> -> vector<2x128xf32>
    %298 = arith.addf %296, %297 : vector<2x128xf32>
    %299 = arith.negf %298 : vector<2x128xf32>
    %300 = math.exp %299 : vector<2x128xf32>
    %cst_60 = arith.constant 1.000000e+00 : f32
    %301 = vector.broadcast %cst_60 : f32 to vector<2x128xf32>
    %302 = arith.addf %301, %300 : vector<2x128xf32>
    %303 = arith.divf %301, %302 : vector<2x128xf32>
    %304 = vector.extract_strided_slice %303 {offsets = [0, 0], sizes = [2, 32], strides = [1, 1]} : vector<2x128xf32> to vector<2x32xf32>
    %305 = vector.extract_strided_slice %303 {offsets = [0, 32], sizes = [2, 32], strides = [1, 1]} : vector<2x128xf32> to vector<2x32xf32>
    %306 = vector.extract_strided_slice %303 {offsets = [0, 64], sizes = [2, 32], strides = [1, 1]} : vector<2x128xf32> to vector<2x32xf32>
    %307 = vector.extract_strided_slice %298 {offsets = [0, 96], sizes = [2, 32], strides = [1, 1]} : vector<2x128xf32> to vector<2x32xf32>
    %308 = math.tanh %307 : vector<2x32xf32>
    %309 = arith.mulf %305, %293 : vector<2x32xf32>
    %310 = arith.mulf %304, %308 : vector<2x32xf32>
    %311 = arith.addf %309, %310 : vector<2x32xf32>
    %312 = math.tanh %311 : vector<2x32xf32>
    %313 = arith.mulf %306, %312 : vector<2x32xf32>
    %c0_61 = arith.constant 0 : index
    %c0_62 = arith.constant 0 : index
    %314 = vector.load %arg7[%c0_61, %c0_62] : memref<32x4xf32, #tpu.memory_space<vmem>>, vector<32x4xf32>
    %cst_63 = arith.constant dense<0.000000e+00> : vector<2x4xf32>
    %315 = tpu.matmul %313, %314, %cst_63 {dimension_numbers = #tpu.dot_dimension_numbers<[1], [0], [0], [1], [0, 0, 1, 1], [], []>} : vector<2x32xf32>, vector<32x4xf32>, vector<2x4xf32> -> vector<2x4xf32>
    %c0_64 = arith.constant 0 : index
    %c0_65 = arith.constant 0 : index
    %316 = vector.load %arg8[%c0_64, %c0_65] : memref<1x4xf32, #tpu.memory_space<vmem>>, vector<1x4xf32>
    %317 = vector.broadcast %316 : vector<1x4xf32> to vector<2x4xf32>
    %318 = arith.addf %315, %317 : vector<2x4xf32>
    %c0_66 = arith.constant 0 : index
    %c0_67 = arith.constant 0 : index
    %319 = vector.load %arg9[%c0_66, %c0_67] : memref<2x4xf32, #tpu.memory_space<vmem>>, vector<2x4xf32>
    tpu.vector_store %arg9[%c0_66, %c0_67], %318 {strides = array<i32>} : memref<2x4xf32, #tpu.memory_space<vmem>>, vector<2x4xf32>,
    return
  }
}

</mosaic_0001>

<bundles_post_ra>
// kernel: tpu_custom_call.1
= control target key start
LH: loop header
LB: loop body
LE: loop exit
PB: predicated region body
PF: predicated region fallthrough
CT: control target
= control target key end

     0   :  { %14 = vsyncpa [#allocation4], 0  ;;  %s3241_s0 = inlined_call_operand.hbm [shape: f32[16,16], index: 0, kind: input, shape index: {}]   ;;  %s3242_s1 = inlined_call_operand.hbm [shape: f32[16,128], index: 1, kind: input, shape index: {}]   ;;  %s3243_s2 = inlined_call_operand.vmem [shape: f32[32,128], index: 2, kind: input, shape index: {}]   ;;  %s3244_s3 = inlined_call_operand.vmem [shape: f32[1,128], index: 3, kind: input, shape index: {}]   ;;  %s3245_s4 = inlined_call_operand.hbm [shape: f32[32,128], index: 4, kind: input, shape index: {}]   ;;  %s3246_s5 = inlined_call_operand.hbm [shape: f32[32,128], index: 5, kind: input, shape index: {}]   ;;  %s3247_s6 = inlined_call_operand.vmem [shape: f32[1,128], index: 6, kind: input, shape index: {}]   ;;  %s3248_s7 = inlined_call_operand.vmem [shape: f32[32,4], index: 7, kind: input, shape index: {}]   ;;  %s3249_s8 = inlined_call_operand.vmem [shape: f32[1,4], index: 8, kind: input, shape index: {}]   ;;  %s3250_s9 = inlined_call_operand.hbm [shape: f32[2,4], index: 9, kind: output, shape index: {}]  }
   0x1   :  { %15 = vsyncpa [#allocation7], 0 }
   0x2   :  { %16 = vsyncpa [#allocation10], 0 }
   0x3   :  { %17 = vsyncpa [#allocation5], 0  ;;  %s2814_s30 = smov [#allocation6]   ;;  %s2815_s11 = smov [#allocation3]  }
   0x4   :  { %s35_s10 = sshll.u32 %s2814_s30, 4  ;;  %s23_s12 = sshll.u32 %s2815_s11, 4  ;;  %s36_s10 = int_to_ptr.vmem [resolvable:$true] %s35_s10  ;;  %s2876_s12 = int_to_ptr.vmem [resolvable:$true] %s23_s12 }
   0x5   :  { %s2696_s15 = scalar_lea.hbm %s3242_s1, 256 }
   0x6   :  { %p2697_p0 = scmp.ne.s32.totalorder %s3242_s1, %s2696_s15  ;;  %p2700_p1 = scmp.lt.u32.totalorder %s2696_s15, %s3242_s1 }
   0x8   :  { %p2702_p2 = pnand %p2700_p1, %p2697_p0 }
   0xa   :  { %2705 = shalt.err (!%p2702_p2)
}
   0xb   :  { %s2706_s20 = scalar_lea.vmem %s36_s10, 256  ;;  %p2711_p4 = scmp.lt.s32.totalorder %s36_s10, %s36_s10 }
   0xc   :  { %p2707_p3 = scmp.ne.s32.totalorder %s36_s10, %s2706_s20  ;;  %p2712_p5 = scmp.lt.s32.totalorder %s2706_s20, %s2706_s20 }
   0xe   :  { %p2713_p6 = por %p2712_p5, %p2711_p4 }
  0x10   :  { %p2714_p7 = pnand %p2713_p6, %p2707_p3 }
  0x12   :  { %2717 = shalt.err (!%p2714_p7)
}
  0x13   :  { %s2816_s21 = smov 128   ;;  %s2817_s22 = smov 8  }
  0x14   :  { %41 = dma.hbm_to_vmem [thread:$0]  %s3242_s1, 256, %s36_s10, [#allocation7], %s2816_s21, %s2816_s21, %s2817_s22  }
  0x15   :  { %s2718_s27 = scalar_lea.hbm %s3241_s0, 256 }
  0x16   :  { %p2719_p8 = scmp.ne.s32.totalorder %s3241_s0, %s2718_s27  ;;  %p2722_p9 = scmp.lt.u32.totalorder %s2718_s27, %s3241_s0 }
  0x18   :  { %p2724_p10 = pnand %p2722_p9, %p2719_p8 }
  0x1a   :  { %2727 = shalt.err (!%p2724_p10)
}
  0x1b   :  { %s2728_s13 = scalar_lea.vmem %s2876_s12, 256  ;;  %p2733_p12 = scmp.lt.s32.totalorder %s2876_s12, %s2876_s12 }
  0x1c   :  { %p2729_p11 = scmp.ne.s32.totalorder %s2876_s12, %s2728_s13  ;;  %p2734_p13 = scmp.lt.s32.totalorder %s2728_s13, %s2728_s13 }
  0x1e   :  { %p2735_p0 = por %p2734_p13, %p2733_p12 }
  0x20   :  { %p2736_p1 = pnand %p2735_p0, %p2729_p11 }
  0x22   :  { %2739 = shalt.err (!%p2736_p1)
}
  0x23   :  { %29 = dma.hbm_to_vmem [thread:$0]  %s3241_s0, 256, %s2876_s12, [#allocation4], %s2816_s21, %s2816_s21, %s2817_s22  }
  0x24   :  { %s2818_s14 = smov [#allocation8]   ;;  %s2819_s16 = smov [#allocation9]  }
  0x25   :  { %s51_s15 = sshll.u32 %s2818_s14, 4  ;;  %s63_s17 = sshll.u32 %s2819_s16, 4  ;;  %s52_s15 = int_to_ptr.vmem [resolvable:$true] %s51_s15  ;;  %s2913_s17 = int_to_ptr.vmem [resolvable:$true] %s63_s17 }
  0x26   :  { %s2740_s20 = scalar_lea.hbm %s3245_s4, 512 }
  0x27   :  { %p2741_p2 = scmp.ne.s32.totalorder %s3245_s4, %s2740_s20  ;;  %p2744_p3 = scmp.lt.u32.totalorder %s2740_s20, %s3245_s4 }
  0x29   :  { %p2746_p4 = pnand %p2744_p3, %p2741_p2 }
  0x2b   :  { %2749 = shalt.err (!%p2746_p4)
}
  0x2c   :  { %s2750_s0 = scalar_lea.vmem %s52_s15, 512  ;;  %p2755_p6 = scmp.lt.s32.totalorder %s52_s15, %s52_s15 }
  0x2d   :  { %p2751_p5 = scmp.ne.s32.totalorder %s52_s15, %s2750_s0  ;;  %p2756_p7 = scmp.lt.s32.totalorder %s2750_s0, %s2750_s0 }
  0x2f   :  { %p2757_p8 = por %p2756_p7, %p2755_p6 }
  0x31   :  { %p2758_p9 = pnand %p2757_p8, %p2751_p5 }
  0x33   :  { %2761 = shalt.err (!%p2758_p9)
}
  0x34   :  { %57 = dma.hbm_to_vmem [thread:$0]  %s3245_s4, 512, %s52_s15, [#allocation7], %s2816_s21, %s2816_s21, %s2817_s22  }
  0x35   :  { %s2762_s30 = scalar_lea.hbm %s3246_s5, 512 }
  0x36   :  { %p2763_p10 = scmp.ne.s32.totalorder %s3246_s5, %s2762_s30  ;;  %p2766_p11 = scmp.lt.u32.totalorder %s2762_s30, %s3246_s5 }
  0x38   :  { %p2768_p12 = pnand %p2766_p11, %p2763_p10 }
  0x3a   :  { %2771 = shalt.err (!%p2768_p12)
}
  0x3b   :  { %s2772_s14 = scalar_lea.vmem %s2913_s17, 512  ;;  %p2777_p0 = scmp.lt.s32.totalorder %s2913_s17, %s2913_s17 }
  0x3c   :  { %p2773_p13 = scmp.ne.s32.totalorder %s2913_s17, %s2772_s14  ;;  %p2778_p1 = scmp.lt.s32.totalorder %s2772_s14, %s2772_s14 }
  0x3e   :  { %p2779_p2 = por %p2778_p1, %p2777_p0 }
  0x40   :  { %p2780_p3 = pnand %p2779_p2, %p2773_p13 }
  0x42   :  { %2783 = shalt.err (!%p2780_p3)
}
  0x43   :  { %69 = dma.hbm_to_vmem [thread:$0]  %s3246_s5, 512, %s2913_s17, [#allocation10], %s2816_s21, %s2816_s21, %s2817_s22  }
  0x44   :  { %2806 = dma.done.wait [#allocation4], 256  }
  0x45   :  { %2807 = vsyncadd [#allocation4], 4294967040 }
  0x46   :  { %2808 = dma.done.wait [#allocation7], 768  }
  0x47   :  { %2809 = vsyncadd [#allocation7], 4294966528 }
  0x48   :  { %2810 = dma.done.wait [#allocation10], 512  }
  0x49   :  { %2811 = vsyncadd [#allocation10], 4294966784  ;;  %v2820_v0 = vmov 0.0|0.0   ;;  %vm2821_vm0 = vmmov 0   ;;  %v2822_v1 = vmov 0.0   ;;  %vm103_vm1 = vcmask 130048  }
  0x4a   :  { %2446 = vmatprep.subr.bf16.mxu1 %v2820_v0  ;;  %2252 = vmatprep.mubr.msk.f32.mxu1 %vm2821_vm0, %v2822_v1  ;;  %v88_v2 = vld [vmem:[#allocation6] sm:$0xff]  ;;  %v89_v3 = vld [vmem:[#allocation6 + $0x8] sm:$0xff]  ;;  %v95_v7 = vld [vmem:[#allocation3] sm:$0xff]  ;;  %s2823_s24 = smov 32   ;;  %vm288_vm2 = vcmask 254976   ;;  %vm185_vm3 = vcmask 261120  }
  0x4b   :  { %v90_v4 = vld [vmem:[%s3243_s2] sm:$0xff]  ;;  %v2442_v5 = vpack.c.bf16 %v89_v3, %v88_v2  ;;  %v91_v6 = vld [vmem:[%s3243_s2 + $0x8] sm:$0xff]  ;;  %2241 = vmatprep.mubr.msk.f32.mxu0 %vm103_vm1, %v95_v7  ;;  %v92_v9 = vld [vmem:[%s3243_s2 + $0x10] sm:$0xff]  ;;  %vm397_vm4 = vcmask 257026   ;;  %vm621_vm5 = vcmask 261126   ;;  %vm509_vm6 = vcmask 259076  }
  0x4c   :  { %v2959_v8 = vpack.c.bf16 %v91_v6, %v90_v4  ;;  %v93_v10 = vld [vmem:[%s3243_s2 + $0x18] sm:$0xff]  ;;  %v2104_v13 = vld [vmem:[%s3244_s3] ss:$0 sm:$0xff]  ;;  %s2824_s3 = smov 64   ;;  %vm2085_vm7 = vcmask 25600  }
  0x4d   :  { %2443 = vmatprep.subr.bf16.mxu0 %v2442_v5  ;;  %v96_v11 = vld [vmem:[#allocation3 + $0x8] sm:$0xff]  ;;  %v2969_v12 = vpack.c.bf16 %v93_v10, %v92_v9 }
  0x4e   :  { %2448 = vmatpush3.bf16.msra.mxu1 %v2959_v8  ;;  %2445 = vmatpush3.bf16.msra.mxu0 %v2442_v5 }
  0x4f   :  { %2449 = vmatprep.subr.bf16.mxu1 %v2820_v0  ;;  %2452 = vmatprep.subr.bf16.mxu0 %v2820_v0 }
  0x51   :  { %2242 = vmatmul.mubr.msk.f32.vlgmr.msra.gmra.mrb[0].mxu0 %vm103_vm1, %v96_v11 }
  0x52   :  { %2451 = vmatpush3.bf16.msra.mxu1 %v2969_v12  ;;  %2454 = vmatpush3.bf16.msra.mxu0 %v2959_v8 }
  0x53   :  { %2455 = vmatprep.subr.bf16.mxu0 %v2820_v0  ;;  %2263 = vmatprep.mubr.msk.f32.mxu0 %vm2821_vm0, %v2822_v1 }
  0x54   :  { %2458 = vmatprep.subr.bf16.mxu1 %v2820_v0 }
  0x55   :  { %2253 = vmatmul.mubr.f32.vlgmr.msra.gmra.mrb[0].mxu1 %v2822_v1 }
  0x56   :  { %2457 = vmatpush3.bf16.msra.mxu0 %v2969_v12  ;;  %2460 = vmatpush3.bf16.msra.mxu1 %v2959_v8 }
  0x57   :  { %2461 = vmatprep.subr.bf16.mxu1 %v2820_v0  ;;  %2274 = vmatprep.mubr.msk.f32.mxu1 %vm2821_vm0, %v2822_v1 }
  0x58   :  { %2464 = vmatprep.subr.bf16.mxu0 %v2820_v0 }
  0x5a   :  { %2463 = vmatpush3.bf16.msra.mxu1 %v2969_v12 }
  0x5b   :  { %2470 = vmatprep.subr.bf16.mxu1 %v2820_v0 }
 0x124   :  { %v2243_v14 = vpop.f32.mrb[0].mxu0 }
 0x125   :  { %v2992_v15 = vadd.f32 %v2243_v14, %v2104_v13  ;;  %v176_v16 = vpop.f32.mrb[1].mxu0 }
 0x126   :  { %v2994_v17 = vadd.f32 %v2104_v13, %v176_v16 }
 0x128   :  { %v255_v18 = vpop.f32.mrb[0].mxu1 }
 0x129   :  { %v259_v19 = vadd.f32 %v255_v18, %v2994_v17  ;;  %v2254_v20 = vpop.f32.mrb[1].mxu1 }
 0x12b   :  { %2568 = vtanh.f32 %v259_v19  ;;  %v2107_v22 = vmul.f32 -1.442695, %v259_v19 }
 0x12d   :  { %2570 = vpow2.f32 %v2107_v22 }
 0x135   :  { %v2569_v21 = vpop.eup %2568 }
 0x136   :  { %269 = vrot.lane.b32.xlu0 %v2569_v21, %s2823_s24 }
 0x137   :  { %v2571_v23 = vpop.eup %2570 }
 0x138   :  { %v263_v24 = vadd.f32 1.0, %v2571_v23 }
 0x13a   :  { %2572 = vrcp.f32 %v263_v24 }
 0x144   :  { %v2573_v25 = vpop.eup %2572 }
 0x145   :  { %v267_v28 = vmul.f32 0.0, %v2573_v25 }
 0x1a8   :  { %v270_v26 = vpop.permute.xlu0 %269 }
 0x1a9   :  { %v272_v27 = vmul.f32 %v2573_v25, %v270_v26 }
 0x1ab   :  { %274 = vrot.lane.b32.xlu0 %v272_v27, %s2823_s24 }
 0x21d   :  { %v275_v29 = vpop.permute.xlu0 %274 }
 0x21e   :  { %v277_v30 = vadd.f32 %v275_v29, %v267_v28 }
 0x220   :  { %2574 = vtanh.f32 %v277_v30  ;;  %v374_v46 = vrot.slane %v277_v30, 6 }
 0x22a   :  { %v2575_v31 = vpop.eup %2574 }
 0x22b   :  { %280 = vrot.lane.b32.xlu1 %v2575_v31, %s2823_s24 }
 0x29d   :  { %v281_v32 = vpop.permute.xlu1 %280 }
 0x29e   :  { %v283_v33 = vmul.f32 %v2573_v25, %v281_v32 }
 0x2a0   :  { %285 = vrot.lane.b32.xlu1 %v283_v33, %s2824_s3 }
 0x312   :  { %v286_v34 = vpop.permute.xlu1 %285 }
 0x313   :  { %289 = vst.msk [vmem:[#allocation2] sm:$0x3] %vm288_vm2, %v286_v34  ;;  %2264 = vmatmul.mubr.msk.f32.vlgmr.msra.gmra.mrb[2].mxu0 %vm185_vm3, %v286_v34 }
 0x314   :  { %2466 = vmatpush3.bf16.msra.mxu0 %v2959_v8  ;;  %2285 = vmatprep.mubr.msk.f32.mxu0 %vm2821_vm0, %v2822_v1 }
 0x315   :  { %2467 = vmatprep.subr.bf16.mxu0 %v2820_v0 }
 0x318   :  { %2469 = vmatpush3.bf16.msra.mxu0 %v2969_v12 }
 0x319   :  { %2476 = vmatprep.subr.bf16.mxu0 %v2820_v0 }
 0x3e6   :  { %v358_v35 = vpop.f32.mrb[2].mxu0 }
 0x3e7   :  { %v363_v36 = vrot.slane %v358_v35, 6  ;;  %v2265_v37 = vpop.f32.mrb[3].mxu0 }
 0x3e9   :  { %v365_v38 = vadd.f32 %v363_v36, %v2994_v17 }
 0x3eb   :  { %2576 = vtanh.f32 %v365_v38  ;;  %v2109_v40 = vmul.f32 -1.442695, %v365_v38 }
 0x3ed   :  { %2578 = vpow2.f32 %v2109_v40 }
 0x3f5   :  { %v2577_v39 = vpop.eup %2576 }
 0x3f6   :  { %378 = vrot.lane.b32.xlu0 %v2577_v39, %s2823_s24 }
 0x3f7   :  { %v2579_v41 = vpop.eup %2578 }
 0x3f8   :  { %v369_v42 = vadd.f32 1.0, %v2579_v41 }
 0x3fa   :  { %2580 = vrcp.f32 %v369_v42 }
 0x404   :  { %v2581_v43 = vpop.eup %2580 }
 0x405   :  { %v376_v47 = vmul.f32 %v2581_v43, %v374_v46 }
 0x468   :  { %v379_v44 = vpop.permute.xlu0 %378 }
 0x469   :  { %v381_v45 = vmul.f32 %v2581_v43, %v379_v44 }
 0x46b   :  { %383 = vrot.lane.b32.xlu1 %v381_v45, %s2823_s24 }
 0x4dd   :  { %v384_v48 = vpop.permute.xlu1 %383 }
 0x4de   :  { %v386_v49 = vadd.f32 %v384_v48, %v376_v47 }
 0x4e0   :  { %2582 = vtanh.f32 %v386_v49  ;;  %v486_v4 = vrot.slane %v386_v49, 6 }
 0x4ea   :  { %v2583_v50 = vpop.eup %2582 }
 0x4eb   :  { %389 = vrot.lane.b32.xlu0 %v2583_v50, %s2823_s24 }
 0x55d   :  { %v390_v51 = vpop.permute.xlu0 %389 }
 0x55e   :  { %v3013_v52 = vmul.f32 %v2581_v43, %v390_v51 }
 0x560   :  { %v399_v53 = vrot.slane %v3013_v52, 2 }
 0x562   :  { %400 = vrot.lane.b32.xlu1 %v399_v53, %s2824_s3 }
 0x5d4   :  { %v401_v54 = vpop.permute.xlu1 %400 }
 0x5d5   :  { %2275 = vmatmul.mubr.msk.f32.vlgmr.msra.gmra.mrb[2].mxu1 %vm185_vm3, %v401_v54 }
 0x5d6   :  { %2472 = vmatpush3.bf16.msra.mxu1 %v2959_v8  ;;  %2296 = vmatprep.mubr.msk.f32.mxu1 %vm2821_vm0, %v2822_v1 }
 0x5d7   :  { %2473 = vmatprep.subr.bf16.mxu1 %v2820_v0 }
 0x5da   :  { %2475 = vmatpush3.bf16.msra.mxu1 %v2969_v12 }
 0x5db   :  { %2482 = vmatprep.subr.bf16.mxu1 %v2820_v0 }
 0x6a8   :  { %v470_v55 = vpop.f32.mrb[2].mxu1 }
 0x6a9   :  { %v475_v56 = vrot.slane %v470_v55, 4  ;;  %v2276_v57 = vpop.f32.mrb[3].mxu1 }
 0x6ab   :  { %v477_v58 = vadd.f32 %v475_v56, %v2994_v17 }
 0x6ad   :  { %2584 = vtanh.f32 %v477_v58  ;;  %v2111_v60 = vmul.f32 -1.442695, %v477_v58 }
 0x6af   :  { %2586 = vpow2.f32 %v2111_v60 }
 0x6b7   :  { %v2585_v59 = vpop.eup %2584 }
 0x6b8   :  { %490 = vrot.lane.b32.xlu0 %v2585_v59, %s2823_s24 }
 0x6b9   :  { %v2587_v61 = vpop.eup %2586 }
 0x6ba   :  { %v481_v62 = vadd.f32 1.0, %v2587_v61 }
 0x6bc   :  { %2588 = vrcp.f32 %v481_v62 }
 0x6c6   :  { %v2589_v63 = vpop.eup %2588 }
 0x6c7   :  { %v488_v5 = vmul.f32 %v2589_v63, %v486_v4 }
 0x72a   :  { %v491_v2 = vpop.permute.xlu0 %490 }
 0x72b   :  { %v493_v3 = vmul.f32 %v2589_v63, %v491_v2 }
 0x72d   :  { %495 = vrot.lane.b32.xlu1 %v493_v3, %s2823_s24 }
 0x79f   :  { %v496_v6 = vpop.permute.xlu1 %495 }
 0x7a0   :  { %v498_v7 = vadd.f32 %v496_v6, %v488_v5 }
 0x7a2   :  { %2590 = vtanh.f32 %v498_v7  ;;  %v598_v28 = vrot.slane %v498_v7, 6 }
 0x7ac   :  { %v2591_v9 = vpop.eup %2590 }
 0x7ad   :  { %501 = vrot.lane.b32.xlu0 %v2591_v9, %s2823_s24 }
 0x81f   :  { %v502_v10 = vpop.permute.xlu0 %501 }
 0x820   :  { %v3028_v11 = vmul.f32 %v2589_v63, %v502_v10 }
 0x822   :  { %v511_v13 = vrot.slane %v3028_v11, 4 }
 0x824   :  { %512 = vrot.lane.b32.xlu1 %v511_v13, %s2824_s3 }
 0x896   :  { %v513_v14 = vpop.permute.xlu1 %512 }
 0x897   :  { %2286 = vmatmul.mubr.msk.f32.vlgmr.msra.gmra.mrb[4].mxu0 %vm185_vm3, %v513_v14 }
 0x898   :  { %2478 = vmatpush3.bf16.msra.mxu0 %v2959_v8  ;;  %2307 = vmatprep.mubr.msk.f32.mxu0 %vm2821_vm0, %v2822_v1 }
 0x899   :  { %2479 = vmatprep.subr.bf16.mxu0 %v2820_v0 }
 0x89c   :  { %2481 = vmatpush3.bf16.msra.mxu0 %v2969_v12 }
 0x89d   :  { %2488 = vmatprep.subr.bf16.mxu0 %v2820_v0 }
 0x96a   :  { %v582_v16 = vpop.f32.mrb[4].mxu0 }
 0x96b   :  { %v587_v18 = vrot.slane %v582_v16, 2  ;;  %v2287_v19 = vpop.f32.mrb[5].mxu0 }
 0x96d   :  { %v589_v20 = vadd.f32 %v587_v18, %v2994_v17 }
 0x96f   :  { %2592 = vtanh.f32 %v589_v20  ;;  %v2113_v22 = vmul.f32 -1.442695, %v589_v20 }
 0x971   :  { %2594 = vpow2.f32 %v2113_v22 }
 0x979   :  { %v2593_v21 = vpop.eup %2592 }
 0x97a   :  { %602 = vrot.lane.b32.xlu0 %v2593_v21, %s2823_s24 }
 0x97b   :  { %v2595_v23 = vpop.eup %2594 }
 0x97c   :  { %v593_v24 = vadd.f32 1.0, %v2595_v23 }
 0x97e   :  { %2596 = vrcp.f32 %v593_v24 }
 0x988   :  { %v2597_v25 = vpop.eup %2596 }
 0x989   :  { %v600_v29 = vmul.f32 %v2597_v25, %v598_v28 }
 0x9ec   :  { %v603_v26 = vpop.permute.xlu0 %602 }
 0x9ed   :  { %v605_v27 = vmul.f32 %v2597_v25, %v603_v26 }
 0x9ef   :  { %607 = vrot.lane.b32.xlu1 %v605_v27, %s2823_s24 }
 0xa61   :  { %v608_v30 = vpop.permute.xlu1 %607 }
 0xa62   :  { %v610_v31 = vadd.f32 %v608_v30, %v600_v29 }
 0xa64   :  { %2598 = vtanh.f32 %v610_v31  ;;  %v707_v46 = vrot.slane %v610_v31, 6 }
 0xa6e   :  { %v2599_v17 = vpop.eup %2598 }
 0xa6f   :  { %613 = vrot.lane.b32.xlu0 %v2599_v17, %s2823_s24 }
 0xae1   :  { %v614_v32 = vpop.permute.xlu0 %613 }
 0xae2   :  { %v3043_v33 = vmul.f32 %v2597_v25, %v614_v32 }
 0xae4   :  { %v623_v34 = vrot.slane %v3043_v33, 6 }
 0xae6   :  { %624 = vrot.lane.b32.xlu1 %v623_v34, %s2824_s3 }
 0xb58   :  { %v625_v35 = vpop.permute.xlu1 %624 }
 0xb59   :  { %2297 = vmatmul.mubr.msk.f32.vlgmr.msra.gmra.mrb[4].mxu1 %vm185_vm3, %v625_v35 }
 0xb5a   :  { %2484 = vmatpush3.bf16.msra.mxu1 %v2959_v8  ;;  %2318 = vmatprep.mubr.msk.f32.mxu1 %vm2821_vm0, %v2822_v1 }
 0xb5b   :  { %2485 = vmatprep.subr.bf16.mxu1 %v2820_v0 }
 0xb5e   :  { %2487 = vmatpush3.bf16.msra.mxu1 %v2969_v12 }
 0xc2c   :  { %v694_v36 = vpop.f32.mrb[4].mxu1 }
 0xc2d   :  { %v698_v37 = vadd.f32 %v694_v36, %v2992_v15  ;;  %v2298_v38 = vpop.f32.mrb[5].mxu1 }
 0xc2f   :  { %2600 = vtanh.f32 %v698_v37  ;;  %v2115_v40 = vmul.f32 -1.442695, %v698_v37 }
 0xc31   :  { %2602 = vpow2.f32 %v2115_v40 }
 0xc39   :  { %v2601_v39 = vpop.eup %2600 }
 0xc3a   :  { %711 = vrot.lane.b32.xlu0 %v2601_v39, %s2823_s24 }
 0xc3b   :  { %v2603_v41 = vpop.eup %2602 }
 0xc3c   :  { %v702_v42 = vadd.f32 1.0, %v2603_v41 }
 0xc3e   :  { %2604 = vrcp.f32 %v702_v42 }
 0xc48   :  { %v2605_v43 = vpop.eup %2604 }
 0xc49   :  { %v709_v47 = vmul.f32 %v2605_v43, %v707_v46 }
 0xcac   :  { %v712_v44 = vpop.permute.xlu0 %711 }
 0xcad   :  { %v714_v45 = vmul.f32 %v2605_v43, %v712_v44 }
 0xcaf   :  { %716 = vrot.lane.b32.xlu1 %v714_v45, %s2823_s24 }
 0xd21   :  { %v717_v48 = vpop.permute.xlu1 %716 }
 0xd22   :  { %v719_v49 = vadd.f32 %v717_v48, %v709_v47 }
 0xd24   :  { %2606 = vtanh.f32 %v719_v49 }
 0xd2e   :  { %v2607_v50 = vpop.eup %2606 }
 0xd2f   :  { %722 = vrot.lane.b32.xlu0 %v2607_v50, %s2823_s24 }
 0xda1   :  { %v723_v51 = vpop.permute.xlu0 %722 }
 0xda2   :  { %v725_v53 = vmul.f32 %v2605_v43, %v723_v51 }
 0xda4   :  { %727 = vrot.lane.b32.xlu1 %v725_v53, %s2824_s3 }
 0xe16   :  { %v728_v54 = vpop.permute.xlu1 %727 }
 0xe17   :  { %730 = vst.msk [vmem:[#allocation2 + $0x8] sm:$0x3] %vm288_vm2, %v728_v54  ;;  %2308 = vmatmul.mubr.msk.f32.vlgmr.msra.gmra.mrb[6].mxu0 %vm185_vm3, %v728_v54  ;;  %v1062_v54 = vld [vmem:[#allocation8 + $0x8] sm:$0xff] }
 0xe18   :  { %2490 = vmatpush3.bf16.msra.mxu0 %v2959_v8  ;;  %2329 = vmatprep.mubr.msk.f32.mxu0 %vm2821_vm0, %v2822_v1 }
 0xe19   :  { %2491 = vmatprep.subr.bf16.mxu0 %v2820_v0 }
 0xe1c   :  { %2493 = vmatpush3.bf16.msra.mxu0 %v2969_v12  ;;  %v815_v12 = vrot.slane %v719_v49, 6 }
 0xe1d   :  { %2502 = vmatprep.subr.bf16.mxu0 %v2820_v0 }
 0xeea   :  { %v799_v55 = vpop.f32.mrb[6].mxu0 }
 0xeeb   :  { %v804_v56 = vrot.slane %v799_v55, 6  ;;  %v2309_v57 = vpop.f32.mrb[7].mxu0 }
 0xeec   :  { %v1066_v57 = vld [vmem:[#allocation9 + $0x8] sm:$0xff] }
 0xeed   :  { %v806_v58 = vadd.f32 %v804_v56, %v2992_v15  ;;  %v1065_v56 = vld [vmem:[#allocation9] sm:$0xff] }
 0xeef   :  { %2608 = vtanh.f32 %v806_v58  ;;  %v2117_v60 = vmul.f32 -1.442695, %v806_v58  ;;  %v1063_v58 = vld [vmem:[#allocation8 + $0x10] sm:$0xff] }
 0xef1   :  { %2610 = vpow2.f32 %v2117_v60  ;;  %v1064_v60 = vld [vmem:[#allocation8 + $0x18] sm:$0xff] }
 0xef9   :  { %v2609_v59 = vpop.eup %2608 }
 0xefa   :  { %819 = vrot.lane.b32.xlu0 %v2609_v59, %s2823_s24  ;;  %v3099_v59 = vpack.c.bf16 %v1066_v57, %v1065_v56 }
 0xefb   :  { %v2611_v8 = vpop.eup %2610 }
 0xefc   :  { %v810_v61 = vadd.f32 1.0, %v2611_v8  ;;  %v1067_v8 = vld [vmem:[#allocation9 + $0x10] sm:$0xff] }
 0xefe   :  { %2612 = vrcp.f32 %v810_v61  ;;  %v1068_v61 = vld [vmem:[#allocation9 + $0x18] sm:$0xff] }
 0xf08   :  { %v2613_v62 = vpop.eup %2612 }
 0xf09   :  { %v817_v3 = vmul.f32 %v2613_v62, %v815_v12 }
 0xf6c   :  { %v820_v63 = vpop.permute.xlu0 %819 }
 0xf6d   :  { %v822_v2 = vmul.f32 %v2613_v62, %v820_v63 }
 0xf6f   :  { %824 = vrot.lane.b32.xlu1 %v822_v2, %s2823_s24 }
 0xfe1   :  { %v825_v4 = vpop.permute.xlu1 %824 }
 0xfe2   :  { %v827_v5 = vadd.f32 %v825_v4, %v817_v3 }
 0xfe4   :  { %2614 = vtanh.f32 %v827_v5  ;;  %v926_v27 = vrot.slane %v827_v5, 6 }
 0xfee   :  { %v2615_v6 = vpop.eup %2614 }
 0xfef   :  { %830 = vrot.lane.b32.xlu0 %v2615_v6, %s2823_s24 }
0x1061   :  { %v831_v7 = vpop.permute.xlu0 %830 }
0x1062   :  { %v3070_v9 = vmul.f32 %v2613_v62, %v831_v7  ;;  %v2498_v62 = vpack.c.bf16 %v1064_v60, %v1063_v58 }
0x1064   :  { %v839_v10 = vrot.slane %v3070_v9, 2 }
0x1066   :  { %840 = vrot.lane.b32.xlu1 %v839_v10, %s2824_s3  ;;  %v2122_v10 = vld [vmem:[%s3247_s6] ss:$0 sm:$0xff] }
0x10d8   :  { %v841_v13 = vpop.permute.xlu1 %840 }
0x10d9   :  { %2319 = vmatmul.mubr.msk.f32.vlgmr.msra.gmra.mrb[6].mxu1 %vm185_vm3, %v841_v13 }
0x11ac   :  { %v910_v14 = vpop.f32.mrb[6].mxu1 }
0x11ad   :  { %v915_v16 = vrot.slane %v910_v14, 4  ;;  %v2320_v18 = vpop.f32.mrb[7].mxu1 }
0x11af   :  { %v917_v19 = vadd.f32 %v915_v16, %v2992_v15 }
0x11b1   :  { %2616 = vtanh.f32 %v917_v19  ;;  %v2119_v21 = vmul.f32 -1.442695, %v917_v19 }
0x11b3   :  { %2618 = vpow2.f32 %v2119_v21 }
0x11bb   :  { %v2617_v20 = vpop.eup %2616 }
0x11bc   :  { %930 = vrot.lane.b32.xlu0 %v2617_v20, %s2823_s24 }
0x11bd   :  { %v2619_v22 = vpop.eup %2618 }
0x11be   :  { %v921_v23 = vadd.f32 1.0, %v2619_v22 }
0x11c0   :  { %2620 = vrcp.f32 %v921_v23 }
0x11ca   :  { %v2621_v24 = vpop.eup %2620 }
0x11cb   :  { %v928_v28 = vmul.f32 %v2621_v24, %v926_v27 }
0x122e   :  { %v931_v25 = vpop.permute.xlu0 %930 }
0x122f   :  { %v933_v26 = vmul.f32 %v2621_v24, %v931_v25 }
0x1231   :  { %935 = vrot.lane.b32.xlu1 %v933_v26, %s2823_s24 }
0x12a3   :  { %v936_v29 = vpop.permute.xlu1 %935 }
0x12a4   :  { %v938_v30 = vadd.f32 %v936_v29, %v928_v28 }
0x12a6   :  { %2622 = vtanh.f32 %v938_v30 }
0x12b0   :  { %v2623_v31 = vpop.eup %2622 }
0x12b1   :  { %941 = vrot.lane.b32.xlu0 %v2623_v31, %s2823_s24 }
0x1323   :  { %v942_v17 = vpop.permute.xlu0 %941 }
0x1324   :  { %v944_v32 = vmul.f32 %v2621_v24, %v942_v17 }
0x1326   :  { %v950_v34 = vrot.slane %v944_v32, 4 }
0x1328   :  { %951 = vrot.lane.b32.xlu1 %v950_v34, %s2824_s3 }
0x139a   :  { %v952_v35 = vpop.permute.xlu1 %951 }
0x139b   :  { %2330 = vmatmul.mubr.msk.f32.vlgmr.msra.gmra.mrb[8].mxu0 %vm185_vm3, %v952_v35 }
0x139c   :  { %2351 = vmatprep.mubr.msk.f32.mxu0 %vm2821_vm0, %v2822_v1  ;;  %2504 = vmatpush3.bf16.msra.mxu0 %v3099_v59 }
0x139d   :  { %2505 = vmatprep.subr.bf16.mxu0 %v2820_v0 }
0x146e   :  { %v1021_v36 = vpop.f32.mrb[8].mxu0 }
0x146f   :  { %v1026_v37 = vrot.slane %v1021_v36, 2  ;;  %v2331_v38 = vpop.f32.mrb[9].mxu0 }
0x1471   :  { %v1028_v39 = vadd.f32 %v1026_v37, %v2992_v15  ;;  %v1037_v15 = vrot.slane %v938_v30, 6 }
0x1473   :  { %2624 = vtanh.f32 %v1028_v39  ;;  %v2121_v41 = vmul.f32 -1.442695, %v1028_v39 }
0x1475   :  { %2626 = vpow2.f32 %v2121_v41 }
0x147d   :  { %v2625_v40 = vpop.eup %2624 }
0x147e   :  { %1041 = vrot.lane.b32.xlu0 %v2625_v40, %s2823_s24 }
0x147f   :  { %v2627_v42 = vpop.eup %2626 }
0x1480   :  { %v1032_v43 = vadd.f32 1.0, %v2627_v42 }
0x1482   :  { %2628 = vrcp.f32 %v1032_v43 }
0x148c   :  { %v2629_v44 = vpop.eup %2628 }
0x148d   :  { %v1039_v47 = vmul.f32 %v2629_v44, %v1037_v15 }
0x14f0   :  { %v1042_v45 = vpop.permute.xlu0 %1041 }
0x14f1   :  { %v1044_v46 = vmul.f32 %v2629_v44, %v1042_v45 }
0x14f3   :  { %1046 = vrot.lane.b32.xlu1 %v1044_v46, %s2823_s24 }
0x14f7   :  { %394 = vrot.lane.b32.xlu1 %v3013_v52, %s2824_s3 }
0x14fb   :  { %618 = vrot.lane.b32.xlu1 %v3043_v33, %s2824_s3  ;;  %v1061_v33 = vld [vmem:[#allocation8] sm:$0xff] }
0x14fc   :  { %v2494_v55 = vpack.c.bf16 %v1062_v54, %v1061_v33 }
0x14fe   :  { %2495 = vmatprep.subr.bf16.mxu1 %v2494_v55 }
0x14ff   :  { %946 = vrot.lane.b32.xlu1 %v944_v32, %s2824_s3  ;;  %2497 = vmatpush3.bf16.msra.mxu1 %v2494_v55 }
0x1500   :  { %2499 = vmatprep.subr.bf16.mxu1 %v2498_v62 }
0x1503   :  { %2501 = vmatpush3.bf16.msra.mxu1 %v2498_v62 }
0x1504   :  { %2508 = vmatprep.subr.bf16.mxu1 %v2820_v0 }
0x1565   :  { %v1047_v48 = vpop.permute.xlu1 %1046 }
0x1566   :  { %v1049_v49 = vadd.f32 %v1047_v48, %v1039_v47 }
0x1568   :  { %2630 = vtanh.f32 %v1049_v49 }
0x1569   :  { %v395_v50 = vpop.permute.xlu1 %394 }
0x156a   :  { %398 = vst.msk [vmem:[#allocation2] sm:$0xc] %vm397_vm4, %v395_v50 }
0x156d   :  { %v619_v51 = vpop.permute.xlu1 %618 }
0x156e   :  { %622 = vst.msk [vmem:[#allocation2] sm:$0xc0] %vm621_vm5, %v619_v51 }
0x1571   :  { %v947_v52 = vpop.permute.xlu1 %946 }
0x1572   :  { %v2631_v53 = vpop.eup %2630  ;;  %949 = vst.msk [vmem:[#allocation2 + $0x8] sm:$0x30] %vm509_vm6, %v947_v52 }
0x1573   :  { %1052 = vrot.lane.b32.xlu0 %v2631_v53, %s2823_s24 }
0x1577   :  { %506 = vrot.lane.b32.xlu0 %v3028_v11, %s2824_s3  ;;  %v3102_v11 = vpack.c.bf16 %v1068_v61, %v1067_v8 }
0x1579   :  { %2507 = vmatpush3.bf16.msra.mxu0 %v3102_v11 }
0x157a   :  { %2514 = vmatprep.subr.bf16.mxu0 %v2820_v0 }
0x157b   :  { %835 = vrot.lane.b32.xlu0 %v3070_v9, %s2824_s3 }
0x157c   :  { %2352 = vmatmul.mubr.f32.vlgmr.msra.gmra.mrb[10].mxu0 %v2822_v1 }
0x157d   :  { %2516 = vmatpush3.bf16.msra.mxu0 %v3099_v59  ;;  %2373 = vmatprep.mubr.msk.f32.mxu0 %vm2821_vm0, %v2822_v1 }
0x157e   :  { %2517 = vmatprep.subr.bf16.mxu0 %v2820_v0 }
0x1581   :  { %2519 = vmatpush3.bf16.msra.mxu0 %v3102_v11 }
0x1582   :  { %2526 = vmatprep.subr.bf16.mxu0 %v2820_v0 }
0x15e5   :  { %v1053_v63 = vpop.permute.xlu0 %1052 }
0x15e6   :  { %v1055_v2 = vmul.f32 %v2629_v44, %v1053_v63 }
0x15e8   :  { %1057 = vrot.lane.b32.xlu0 %v1055_v2, %s2824_s3 }
0x15e9   :  { %v507_v12 = vpop.permute.xlu0 %506 }
0x15ea   :  { %510 = vst.msk [vmem:[#allocation2] sm:$0x30] %vm509_vm6, %v507_v12 }
0x15ed   :  { %v836_v3 = vpop.permute.xlu0 %835 }
0x15ee   :  { %838 = vst.msk [vmem:[#allocation2 + $0x8] sm:$0xc] %vm397_vm4, %v836_v3 }
0x15f1   :  { %v1070_v4 = vld [vmem:[#allocation2] sm:$0xff] }
0x15f2   :  { %2340 = vmatprep.mubr.msk.f32.mxu1 %vm185_vm3, %v1070_v4 }
0x164f   :  { %v1225_v7 = vpop.f32.mrb[10].mxu0 }
0x1650   :  { %v2353_v9 = vpop.f32.mrb[11].mxu0 }
0x165a   :  { %v1058_v5 = vpop.permute.xlu0 %1057 }
0x165b   :  { %1060 = vst.msk [vmem:[#allocation2 + $0x8] sm:$0xc0] %vm621_vm5, %v1058_v5 }
0x1662   :  { %v1071_v6 = vld [vmem:[#allocation2 + $0x8] sm:$0xff] }
0x1663   :  { %2341 = vmatmul.mubr.msk.f32.vlgmr.msra.gmra.mrb[8].mxu1 %vm185_vm3, %v1071_v6 }
0x1664   :  { %2510 = vmatpush3.bf16.msra.mxu1 %v3099_v59  ;;  %2362 = vmatprep.mubr.msk.f32.mxu1 %vm2821_vm0, %v2822_v1 }
0x1665   :  { %2511 = vmatprep.subr.bf16.mxu1 %v2820_v0 }
0x1668   :  { %2513 = vmatpush3.bf16.msra.mxu1 %v3102_v11 }
0x1669   :  { %2520 = vmatprep.subr.bf16.mxu1 %v2820_v0 }
0x1736   :  { %v2342_v13 = vpop.f32.mrb[8].mxu1 }
0x1737   :  { %v3130_v14 = vadd.f32 %v2342_v13, %v2122_v10  ;;  %v1150_v16 = vpop.f32.mrb[9].mxu1 }
0x1738   :  { %v3132_v18 = vadd.f32 %v2122_v10, %v1150_v16 }
0x173a   :  { %v1229_v19 = vadd.f32 %v1225_v7, %v3132_v18 }
0x173c   :  { %2632 = vtanh.f32 %v1229_v19  ;;  %v2125_v21 = vmul.f32 -1.442695, %v1229_v19 }
0x173e   :  { %2634 = vpow2.f32 %v2125_v21 }
0x1746   :  { %v2633_v20 = vpop.eup %2632 }
0x1747   :  { %1239 = vrot.lane.b32.xlu1 %v2633_v20, %s2823_s24 }
0x1748   :  { %v2635_v22 = vpop.eup %2634 }
0x1749   :  { %v1233_v23 = vadd.f32 1.0, %v2635_v22 }
0x174b   :  { %2636 = vrcp.f32 %v1233_v23 }
0x1755   :  { %v2637_v24 = vpop.eup %2636 }
0x1756   :  { %v1237_v27 = vmul.f32 0.0, %v2637_v24 }
0x17b9   :  { %v1240_v25 = vpop.permute.xlu1 %1239 }
0x17ba   :  { %v1242_v26 = vmul.f32 %v2637_v24, %v1240_v25 }
0x17bc   :  { %1244 = vrot.lane.b32.xlu0 %v1242_v26, %s2823_s24 }
0x182e   :  { %v1245_v28 = vpop.permute.xlu0 %1244 }
0x182f   :  { %v1247_v29 = vadd.f32 %v1245_v28, %v1237_v27 }
0x1831   :  { %2638 = vtanh.f32 %v1247_v29  ;;  %v1341_v45 = vrot.slane %v1247_v29, 6 }
0x183b   :  { %v2639_v30 = vpop.eup %2638 }
0x183c   :  { %1250 = vrot.lane.b32.xlu1 %v2639_v30, %s2823_s24 }
0x18ae   :  { %v1251_v31 = vpop.permute.xlu1 %1250 }
0x18af   :  { %v1253_v17 = vmul.f32 %v2637_v24, %v1251_v31 }
0x18b1   :  { %1255 = vrot.lane.b32.xlu0 %v1253_v17, %s2824_s3 }
0x1923   :  { %v1256_v32 = vpop.permute.xlu0 %1255 }
0x1924   :  { %2363 = vmatmul.mubr.msk.f32.vlgmr.msra.gmra.mrb[10].mxu1 %vm185_vm3, %v1256_v32 }
0x1925   :  { %2522 = vmatpush3.bf16.msra.mxu1 %v3099_v59  ;;  %2384 = vmatprep.mubr.msk.f32.mxu1 %vm2821_vm0, %v2822_v1 }
0x1926   :  { %2523 = vmatprep.subr.bf16.mxu1 %v2820_v0 }
0x1929   :  { %2525 = vmatpush3.bf16.msra.mxu1 %v3102_v11 }
0x192a   :  { %2532 = vmatprep.subr.bf16.mxu1 %v2820_v0 }
0x19f7   :  { %v1325_v34 = vpop.f32.mrb[10].mxu1 }
0x19f8   :  { %v1330_v35 = vrot.slane %v1325_v34, 6  ;;  %v2364_v36 = vpop.f32.mrb[11].mxu1 }
0x19fa   :  { %v1332_v37 = vadd.f32 %v1330_v35, %v3132_v18 }
0x19fc   :  { %2640 = vtanh.f32 %v1332_v37  ;;  %v2127_v39 = vmul.f32 -1.442695, %v1332_v37 }
0x19fe   :  { %2642 = vpow2.f32 %v2127_v39 }
0x1a06   :  { %v2641_v38 = vpop.eup %2640 }
0x1a07   :  { %1345 = vrot.lane.b32.xlu1 %v2641_v38, %s2823_s24 }
0x1a08   :  { %v2643_v40 = vpop.eup %2642 }
0x1a09   :  { %v1336_v41 = vadd.f32 1.0, %v2643_v40 }
0x1a0b   :  { %2644 = vrcp.f32 %v1336_v41 }
0x1a15   :  { %v2645_v42 = vpop.eup %2644 }
0x1a16   :  { %v1343_v46 = vmul.f32 %v2645_v42, %v1341_v45 }
0x1a79   :  { %v1346_v43 = vpop.permute.xlu1 %1345 }
0x1a7a   :  { %v1348_v44 = vmul.f32 %v2645_v42, %v1346_v43 }
0x1a7c   :  { %1350 = vrot.lane.b32.xlu0 %v1348_v44, %s2823_s24 }
0x1aee   :  { %v1351_v15 = vpop.permute.xlu0 %1350 }
0x1aef   :  { %v1353_v47 = vadd.f32 %v1351_v15, %v1343_v46 }
0x1af1   :  { %2646 = vtanh.f32 %v1353_v47  ;;  %v1448_v63 = vrot.slane %v1353_v47, 6 }
0x1afb   :  { %v2647_v48 = vpop.eup %2646 }
0x1afc   :  { %1356 = vrot.lane.b32.xlu1 %v2647_v48, %s2823_s24 }
0x1b6e   :  { %v1357_v49 = vpop.permute.xlu1 %1356 }
0x1b6f   :  { %v1359_v50 = vmul.f32 %v2645_v42, %v1357_v49 }
0x1b71   :  { %v1361_v51 = vrot.slane %v1359_v50, 2 }
0x1b73   :  { %1362 = vrot.lane.b32.xlu0 %v1361_v51, %s2824_s3 }
0x1be5   :  { %v1363_v52 = vpop.permute.xlu0 %1362 }
0x1be6   :  { %2374 = vmatmul.mubr.msk.f32.vlgmr.msra.gmra.mrb[12].mxu0 %vm185_vm3, %v1363_v52 }
0x1be7   :  { %2528 = vmatpush3.bf16.msra.mxu0 %v3099_v59  ;;  %2395 = vmatprep.mubr.msk.f32.mxu0 %vm2821_vm0, %v2822_v1 }
0x1be8   :  { %2529 = vmatprep.subr.bf16.mxu0 %v2820_v0 }
0x1beb   :  { %2531 = vmatpush3.bf16.msra.mxu0 %v3102_v11 }
0x1bec   :  { %2538 = vmatprep.subr.bf16.mxu0 %v2820_v0 }
0x1cb9   :  { %v1432_v53 = vpop.f32.mrb[12].mxu0 }
0x1cba   :  { %v1437_v33 = vrot.slane %v1432_v53, 4  ;;  %v2375_v54 = vpop.f32.mrb[13].mxu0 }
0x1cbc   :  { %v1439_v55 = vadd.f32 %v1437_v33, %v3132_v18 }
0x1cbe   :  { %2648 = vtanh.f32 %v1439_v55  ;;  %v2129_v57 = vmul.f32 -1.442695, %v1439_v55 }
0x1cc0   :  { %2650 = vpow2.f32 %v2129_v57 }
0x1cc8   :  { %v2649_v56 = vpop.eup %2648 }
0x1cc9   :  { %1452 = vrot.lane.b32.xlu1 %v2649_v56, %s2823_s24 }
0x1cca   :  { %v2651_v58 = vpop.eup %2650 }
0x1ccb   :  { %v1443_v60 = vadd.f32 1.0, %v2651_v58 }
0x1ccd   :  { %2652 = vrcp.f32 %v1443_v60 }
0x1cd7   :  { %v2653_v8 = vpop.eup %2652 }
0x1cd8   :  { %v1450_v2 = vmul.f32 %v2653_v8, %v1448_v63 }
0x1d3b   :  { %v1453_v61 = vpop.permute.xlu1 %1452 }
0x1d3c   :  { %v1455_v62 = vmul.f32 %v2653_v8, %v1453_v61 }
0x1d3e   :  { %1457 = vrot.lane.b32.xlu0 %v1455_v62, %s2823_s24 }
0x1db0   :  { %v1458_v12 = vpop.permute.xlu0 %1457 }
0x1db1   :  { %v1460_v3 = vadd.f32 %v1458_v12, %v1450_v2 }
0x1db3   :  { %2654 = vtanh.f32 %v1460_v3  ;;  %v1555_v27 = vrot.slane %v1460_v3, 6 }
0x1dbd   :  { %v2655_v4 = vpop.eup %2654 }
0x1dbe   :  { %1463 = vrot.lane.b32.xlu1 %v2655_v4, %s2823_s24 }
0x1e30   :  { %v1464_v5 = vpop.permute.xlu1 %1463 }
0x1e31   :  { %v1466_v6 = vmul.f32 %v2653_v8, %v1464_v5 }
0x1e33   :  { %v1468_v7 = vrot.slane %v1466_v6, 4 }
0x1e35   :  { %1469 = vrot.lane.b32.xlu0 %v1468_v7, %s2824_s3 }
0x1ea7   :  { %v1470_v9 = vpop.permute.xlu0 %1469 }
0x1ea8   :  { %2385 = vmatmul.mubr.msk.f32.vlgmr.msra.gmra.mrb[12].mxu1 %vm185_vm3, %v1470_v9 }
0x1ea9   :  { %2534 = vmatpush3.bf16.msra.mxu1 %v3099_v59  ;;  %2406 = vmatprep.mubr.msk.f32.mxu1 %vm2821_vm0, %v2822_v1 }
0x1eaa   :  { %2535 = vmatprep.subr.bf16.mxu1 %v2820_v0 }
0x1ead   :  { %2537 = vmatpush3.bf16.msra.mxu1 %v3102_v11 }
0x1eae   :  { %2544 = vmatprep.subr.bf16.mxu1 %v2820_v0 }
0x1f7b   :  { %v1539_v10 = vpop.f32.mrb[12].mxu1 }
0x1f7c   :  { %v1544_v13 = vrot.slane %v1539_v10, 2  ;;  %v2386_v16 = vpop.f32.mrb[13].mxu1 }
0x1f7e   :  { %v1546_v19 = vadd.f32 %v1544_v13, %v3132_v18 }
0x1f80   :  { %2656 = vtanh.f32 %v1546_v19  ;;  %v2131_v21 = vmul.f32 -1.442695, %v1546_v19 }
0x1f82   :  { %2658 = vpow2.f32 %v2131_v21 }
0x1f8a   :  { %v2657_v20 = vpop.eup %2656 }
0x1f8b   :  { %1559 = vrot.lane.b32.xlu1 %v2657_v20, %s2823_s24 }
0x1f8c   :  { %v2659_v22 = vpop.eup %2658 }
0x1f8d   :  { %v1550_v23 = vadd.f32 1.0, %v2659_v22 }
0x1f8f   :  { %2660 = vrcp.f32 %v1550_v23 }
0x1f99   :  { %v2661_v24 = vpop.eup %2660 }
0x1f9a   :  { %v1557_v28 = vmul.f32 %v2661_v24, %v1555_v27 }
0x1ffd   :  { %v1560_v25 = vpop.permute.xlu1 %1559 }
0x1ffe   :  { %v1562_v26 = vmul.f32 %v2661_v24, %v1560_v25 }
0x2000   :  { %1564 = vrot.lane.b32.xlu0 %v1562_v26, %s2823_s24 }
0x2072   :  { %v1565_v29 = vpop.permute.xlu0 %1564 }
0x2073   :  { %v1567_v30 = vadd.f32 %v1565_v29, %v1557_v28 }
0x2075   :  { %2662 = vtanh.f32 %v1567_v30  ;;  %v1659_v45 = vrot.slane %v1567_v30, 6 }
0x207f   :  { %v2663_v18 = vpop.eup %2662 }
0x2080   :  { %1570 = vrot.lane.b32.xlu1 %v2663_v18, %s2823_s24 }
0x20f2   :  { %v1571_v31 = vpop.permute.xlu1 %1570 }
0x20f3   :  { %v1573_v17 = vmul.f32 %v2661_v24, %v1571_v31 }
0x20f5   :  { %v1575_v32 = vrot.slane %v1573_v17, 6 }
0x20f7   :  { %1576 = vrot.lane.b32.xlu0 %v1575_v32, %s2824_s3 }
0x2169   :  { %v1577_v34 = vpop.permute.xlu0 %1576 }
0x216a   :  { %2396 = vmatmul.mubr.msk.f32.vlgmr.msra.gmra.mrb[14].mxu0 %vm185_vm3, %v1577_v34 }
0x216b   :  { %2540 = vmatpush3.bf16.msra.mxu0 %v3099_v59  ;;  %2417 = vmatprep.mubr.msk.f32.mxu0 %vm2821_vm0, %v2822_v1 }
0x216c   :  { %2541 = vmatprep.subr.bf16.mxu0 %v2820_v0 }
0x216f   :  { %2543 = vmatpush3.bf16.msra.mxu0 %v3102_v11 }
0x2170   :  { %2550 = vmatprep.subr.bf16.mxu0 %v2820_v0 }
0x223d   :  { %v1646_v35 = vpop.f32.mrb[14].mxu0 }
0x223e   :  { %v1650_v36 = vadd.f32 %v1646_v35, %v3130_v14  ;;  %v2397_v37 = vpop.f32.mrb[15].mxu0 }
0x2240   :  { %2664 = vtanh.f32 %v1650_v36  ;;  %v2133_v39 = vmul.f32 -1.442695, %v1650_v36 }
0x2242   :  { %2666 = vpow2.f32 %v2133_v39 }
0x224a   :  { %v2665_v38 = vpop.eup %2664 }
0x224b   :  { %1663 = vrot.lane.b32.xlu1 %v2665_v38, %s2823_s24 }
0x224c   :  { %v2667_v40 = vpop.eup %2666 }
0x224d   :  { %v1654_v41 = vadd.f32 1.0, %v2667_v40 }
0x224f   :  { %2668 = vrcp.f32 %v1654_v41 }
0x2259   :  { %v2669_v42 = vpop.eup %2668 }
0x225a   :  { %v1661_v46 = vmul.f32 %v2669_v42, %v1659_v45 }
0x22bd   :  { %v1664_v43 = vpop.permute.xlu1 %1663 }
0x22be   :  { %v1666_v44 = vmul.f32 %v2669_v42, %v1664_v43 }
0x22c0   :  { %1668 = vrot.lane.b32.xlu0 %v1666_v44, %s2823_s24 }
0x2332   :  { %v1669_v15 = vpop.permute.xlu0 %1668 }
0x2333   :  { %v1671_v47 = vadd.f32 %v1669_v15, %v1661_v46  ;;  %v1999_v46 = vld [vmem:[%s3248_s7 + $0x8] sm:$0xff]  ;;  %v2000_v15 = vld [vmem:[%s3248_s7 + $0x10] sm:$0xff] }
0x2335   :  { %2670 = vtanh.f32 %v1671_v47 }
0x233f   :  { %v2671_v48 = vpop.eup %2670 }
0x2340   :  { %1674 = vrot.lane.b32.xlu1 %v2671_v48, %s2823_s24  ;;  %v2001_v48 = vld [vmem:[%s3248_s7 + $0x18] sm:$0xff] }
0x23b2   :  { %v1675_v49 = vpop.permute.xlu1 %1674 }
0x23b3   :  { %v1677_v50 = vmul.f32 %v2669_v42, %v1675_v49  ;;  %v2554_v49 = vpack.c.bf16 %v2001_v48, %v2000_v15 }
0x23b5   :  { %1679 = vrot.lane.b32.xlu0 %v1677_v50, %s2824_s3 }
0x2427   :  { %v1680_v51 = vpop.permute.xlu0 %1679 }
0x2428   :  { %2407 = vmatmul.mubr.msk.f32.vlgmr.msra.gmra.mrb[14].mxu1 %vm185_vm3, %v1680_v51 }
0x2429   :  { %2546 = vmatpush3.bf16.msra.mxu1 %v3099_v59  ;;  %2428 = vmatprep.mubr.msk.f32.mxu1 %vm2821_vm0, %v2822_v1 }
0x242a   :  { %2547 = vmatprep.subr.bf16.mxu1 %v2820_v0 }
0x242d   :  { %2549 = vmatpush3.bf16.msra.mxu1 %v3102_v11  ;;  %v1765_v11 = vrot.slane %v1671_v47, 6 }
0x24fb   :  { %v1749_v52 = vpop.f32.mrb[14].mxu1 }
0x24fc   :  { %v1754_v53 = vrot.slane %v1749_v52, 6  ;;  %v2408_v33 = vpop.f32.mrb[15].mxu1 }
0x24fe   :  { %v1756_v54 = vadd.f32 %v1754_v53, %v3130_v14 }
0x2500   :  { %2672 = vtanh.f32 %v1756_v54  ;;  %v2135_v56 = vmul.f32 -1.442695, %v1756_v54  ;;  %v2140_v54 = vld [vmem:[%s3249_s8] ss:$0 sm:$0xff] }
0x2502   :  { %2674 = vpow2.f32 %v2135_v56 }
0x250a   :  { %v2673_v55 = vpop.eup %2672 }
0x250b   :  { %1769 = vrot.lane.b32.xlu1 %v2673_v55, %s2823_s24 }
0x250c   :  { %v2675_v57 = vpop.eup %2674 }
0x250d   :  { %v1760_v59 = vadd.f32 1.0, %v2675_v57 }
0x250f   :  { %2676 = vrcp.f32 %v1760_v59 }
0x2519   :  { %v2677_v58 = vpop.eup %2676 }
0x251a   :  { %v1767_v61 = vmul.f32 %v2677_v58, %v1765_v11 }
0x257d   :  { %v1770_v60 = vpop.permute.xlu1 %1769 }
0x257e   :  { %v1772_v8 = vmul.f32 %v2677_v58, %v1770_v60 }
0x2580   :  { %1774 = vrot.lane.b32.xlu0 %v1772_v8, %s2823_s24 }
0x25f2   :  { %v1775_v62 = vpop.permute.xlu0 %1774 }
0x25f3   :  { %v1777_v63 = vadd.f32 %v1775_v62, %v1767_v61 }
0x25f5   :  { %2678 = vtanh.f32 %v1777_v63 }
0x25ff   :  { %v2679_v2 = vpop.eup %2678 }
0x2600   :  { %1780 = vrot.lane.b32.xlu1 %v2679_v2, %s2823_s24 }
0x2672   :  { %v1781_v12 = vpop.permute.xlu1 %1780 }
0x2673   :  { %v1783_v3 = vmul.f32 %v2677_v58, %v1781_v12 }
0x2675   :  { %v1785_v4 = vrot.slane %v1783_v3, 2 }
0x2677   :  { %1786 = vrot.lane.b32.xlu0 %v1785_v4, %s2824_s3 }
0x26e9   :  { %v1787_v5 = vpop.permute.xlu0 %1786 }
0x26ea   :  { %2418 = vmatmul.mubr.msk.f32.vlgmr.msra.gmra.mrb[16].mxu0 %vm185_vm3, %v1787_v5 }
0x26eb   :  { %2439 = vmatprep.mubr.msk.f32.mxu0 %vm2821_vm0, %v2822_v1  ;;  %v1872_v1 = vrot.slane %v1777_v63, 6 }
0x27bd   :  { %v1856_v6 = vpop.f32.mrb[16].mxu0 }
0x27be   :  { %v1861_v7 = vrot.slane %v1856_v6, 4  ;;  %v2419_v9 = vpop.f32.mrb[17].mxu0 }
0x27c0   :  { %v1863_v10 = vadd.f32 %v1861_v7, %v3130_v14 }
0x27c2   :  { %2680 = vtanh.f32 %v1863_v10  ;;  %v2137_v16 = vmul.f32 -1.442695, %v1863_v10 }
0x27c4   :  { %2682 = vpow2.f32 %v2137_v16 }
0x27cc   :  { %v2681_v13 = vpop.eup %2680 }
0x27cd   :  { %1876 = vrot.lane.b32.xlu1 %v2681_v13, %s2823_s24 }
0x27ce   :  { %v2683_v19 = vpop.eup %2682 }
0x27cf   :  { %v1867_v20 = vadd.f32 1.0, %v2683_v19 }
0x27d1   :  { %2684 = vrcp.f32 %v1867_v20 }
0x27db   :  { %v2685_v21 = vpop.eup %2684 }
0x27dc   :  { %v1874_v24 = vmul.f32 %v2685_v21, %v1872_v1 }
0x283f   :  { %v1877_v22 = vpop.permute.xlu1 %1876 }
0x2840   :  { %v1879_v23 = vmul.f32 %v2685_v21, %v1877_v22 }
0x2842   :  { %1881 = vrot.lane.b32.xlu0 %v1879_v23, %s2823_s24 }
0x28b4   :  { %v1882_v25 = vpop.permute.xlu0 %1881 }
0x28b5   :  { %v1884_v26 = vadd.f32 %v1882_v25, %v1874_v24 }
0x28b7   :  { %2686 = vtanh.f32 %v1884_v26  ;;  %v1979_v42 = vrot.slane %v1884_v26, 6 }
0x28c1   :  { %v2687_v27 = vpop.eup %2686 }
0x28c2   :  { %1887 = vrot.lane.b32.xlu1 %v2687_v27, %s2823_s24 }
0x2934   :  { %v1888_v28 = vpop.permute.xlu1 %1887 }
0x2935   :  { %v1890_v29 = vmul.f32 %v2685_v21, %v1888_v28 }
0x2937   :  { %v1892_v30 = vrot.slane %v1890_v29, 4 }
0x2939   :  { %1893 = vrot.lane.b32.xlu0 %v1892_v30, %s2824_s3 }
0x29ab   :  { %v1894_v18 = vpop.permute.xlu0 %1893 }
0x29ac   :  { %2429 = vmatmul.mubr.msk.f32.vlgmr.msra.gmra.mrb[16].mxu1 %vm185_vm3, %v1894_v18 }
0x2a7f   :  { %v1963_v31 = vpop.f32.mrb[16].mxu1 }
0x2a80   :  { %v1968_v17 = vrot.slane %v1963_v31, 2  ;;  %v2430_v32 = vpop.f32.mrb[17].mxu1 }
0x2a82   :  { %v1970_v34 = vadd.f32 %v1968_v17, %v3130_v14  ;;  %v1998_v14 = vld [vmem:[%s3248_s7] sm:$0xff]  ;;  %s2825_s7 = smov [#allocation11]  }
0x2a83   :  { %v2551_v47 = vpack.c.bf16 %v1999_v46, %v1998_v14  ;;  %s2093_s10 = sshll.u32 %s2825_s7, 4  ;;  %s2094_s10 = int_to_ptr.vmem [resolvable:$true] %s2093_s10 }
0x2a84   :  { %2688 = vtanh.f32 %v1970_v34  ;;  %v2139_v36 = vmul.f32 -1.442695, %v1970_v34  ;;  %s2784_s14 = scalar_lea.vmem %s2094_s10, 32  ;;  %p2789_p5 = scmp.lt.s32.totalorder %s2094_s10, %s2094_s10 }
0x2a85   :  { %2552 = vmatpush3.bf16.msra.mxu0 %v2551_v47  ;;  %p2785_p4 = scmp.ne.s32.totalorder %s2094_s10, %s2784_s14  ;;  %p2790_p6 = scmp.lt.s32.totalorder %s2784_s14, %s2784_s14 }
0x2a86   :  { %2690 = vpow2.f32 %v2139_v36  ;;  %2553 = vmatprep.subr.bf16.mxu0 %v2820_v0 }
0x2a87   :  { %p2791_p7 = por %p2790_p6, %p2789_p5 }
0x2a89   :  { %2555 = vmatpush3.bf16.msra.mxu0 %v2554_v49  ;;  %p2792_p8 = pnand %p2791_p7, %p2785_p4 }
0x2a8e   :  { %v2689_v35 = vpop.eup %2688 }
0x2a8f   :  { %1983 = vrot.lane.b32.xlu1 %v2689_v35, %s2823_s24 }
0x2a90   :  { %v2691_v37 = vpop.eup %2690 }
0x2a91   :  { %v1974_v38 = vadd.f32 1.0, %v2691_v37 }
0x2a93   :  { %2692 = vrcp.f32 %v1974_v38 }
0x2a9d   :  { %v2693_v39 = vpop.eup %2692 }
0x2a9e   :  { %v1981_v43 = vmul.f32 %v2693_v39, %v1979_v42 }
0x2b01   :  { %v1984_v40 = vpop.permute.xlu1 %1983 }
0x2b02   :  { %v1986_v41 = vmul.f32 %v2693_v39, %v1984_v40 }
0x2b04   :  { %1988 = vrot.lane.b32.xlu0 %v1986_v41, %s2823_s24 }
0x2b76   :  { %v1989_v44 = vpop.permute.xlu0 %1988 }
0x2b77   :  { %v1991_v45 = vadd.f32 %v1989_v44, %v1981_v43 }
0x2b79   :  { %2694 = vtanh.f32 %v1991_v45 }
0x2b83   :  { %v2695_v50 = vpop.eup %2694 }
0x2b84   :  { %1994 = vrot.lane.b32.xlu1 %v2695_v50, %s2823_s24 }
0x2bf6   :  { %v1995_v51 = vpop.permute.xlu1 %1994 }
0x2bf7   :  { %v1997_v52 = vmul.f32 %v2693_v39, %v1995_v51 }
0x2bf9   :  { %v2010_v53 = vrot.slane %v1997_v52, 6 }
0x2bfb   :  { %2011 = vrot.lane.b32.xlu0 %v2010_v53, %s2824_s3 }
0x2c6d   :  { %v2012_v33 = vpop.permute.xlu0 %2011 }
0x2c6e   :  { %2440 = vmatmul.mubr.msk.f32.vlgmr.msra.gmra.mrb[18].mxu0 %vm185_vm3, %v2012_v33 }
0x2d41   :  { %v2081_v55 = vpop.f32.mrb[18].mxu0 }
0x2d42   :  { %v2082_v0 = vadd.f32 %v2140_v54, %v2081_v55  ;;  %v2441_v56 = vpop.f32.mrb[19].mxu0 }
0x2d44   :  { %2086 = vst.msk [vmem:[#allocation11] sm:$0x3] %vm2085_vm7, %v2082_v0 }
0x2d45   :  { %2795 = shalt.err (!%p2792_p8)
}
0x2d46   :  { %s2796_s16 = scalar_lea.hbm %s3250_s9, 32 }
0x2d47   :  { %p2797_p9 = scmp.ne.s32.totalorder %s3250_s9, %s2796_s16  ;;  %p2800_p10 = scmp.lt.u32.totalorder %s2796_s16, %s3250_s9 }
0x2d49   :  { %p2802_p11 = pnand %p2800_p10, %p2797_p9 }
0x2d4b   :  { %2805 = shalt.err (!%p2802_p11)
}
0x2d4c   :  { %2096 = dma.vmem_to_hbm [thread:$0]  %s2094_s10, 32, %s3250_s9, [#allocation5]  }
0x2d4d   :  { %2812 = dma.done.wait [#allocation5], 32  }
0x2d4e   :  { %2813 = vsyncadd [#allocation5], 4294967264 }
0x2d4f   :  { %2100 = vsyncpa [#allocation4], 1 }
0x2d50   :  { %2101 = vsyncpa [#allocation7], 1 }
0x2d51   :  { %2102 = vsyncpa [#allocation10], 1 }
0x2d52   :  { %2103 = vsyncpa [#allocation5], 1 }

</bundles_post_ra>
